<compile_context>
chip_gen: v6e
topology: v6e:2x2x1
jax: 0.10.0
libtpu: 0.0.40
codegen_flags: <defaults>
</compile_context>

<pallas_src>
from functools import partial

import jax
import jax.numpy as jnp
from jax import lax
from jax.experimental import pallas as pl
from jax.experimental.pallas import tpu as pltpu

NUM_TASKS = 6
DECOMP_ORDER = ("spectacles", "occlusion", "facial_hair", "emotion", "pose", "gender")
NHEADS = 2 * NUM_TASKS + 1      # 6 task heads + 6 domain-adversarial heads + id head
NHEADS_PAD = 16                 # sublane-friendly head axis

_PER_TASK_NCLS = {
    "spectacles": 2, "occlusion": 2, "facial_hair": 2,
    "emotion": 7, "pose": 3, "gender": 2,
}


def _head_ncls(num_classes):
    # head index layout: (task_t head, da_t head) for t in DECOMP_ORDER, id head last.
    ncls = []
    for t in DECOMP_ORDER:
        ncls += [_PER_TASK_NCLS[t], _PER_TASK_NCLS[t]]
    ncls.append(num_classes)
    return ncls


def _round_up(x, m):
    return (x + m - 1) // m * m


def _choose_bimg(batch, target=8):
    """Largest divisor of `batch` that keeps the grid length >= 2 (v7x has two
    TensorCores; the parallel batch axis is what shards across them) and is
    <= `target` (v5e ~8, v6e can use 16)."""
    cap = max(1, min(target, batch // 2)) if batch >= 2 else 1
    for cand in range(cap, 0, -1):
        if batch % cand == 0:
            return cand
    return 1


# ----------------------------------------------------------------------------
# Fused kernel: stem conv GEMM -> attention decomposition -> GAP -> 13 MLP heads
# ----------------------------------------------------------------------------
def _mtl_fused_kernel(x_ref, wstem_ref, bstem_ref, watt_ref, batt_ref,
                      w1_ref, b1_ref, w2_ref, b2_ref, o_ref,
                      *, bimg, hw, hwpad):
    inv_hw = 1.0 / float(hw)
    ncls_pad = o_ref.shape[-1]
    cfeat = wstem_ref.shape[-1]

    # ---- per-image: im2col stem GEMM -> attention -> G (registers) -> pooled
    pooled_list = []
    for b in range(bimg):
        xcol = x_ref[b]                                               # (hwpad, K) bf16
        feat = jnp.dot(xcol, wstem_ref[...],
                       preferred_element_type=jnp.float32)            # (hwpad, C) f32
        feat = jnp.maximum(feat + bstem_ref[...], 0.0)
        if hwpad != hw:                                                # in-kernel row mask
            rid = lax.broadcasted_iota(jnp.int32, (hwpad, cfeat), 0)
            feat = jnp.where(rid < hw, feat, 0.0)
        feat_bf = feat.astype(jnp.bfloat16)

        # per-task attention map in transposed (T, hwpad) layout.
        att_logits = lax.dot_general(
            watt_ref[...], feat_bf, (((1,), (1,)), ((), ())),
            preferred_element_type=jnp.float32) + batt_ref[...]
        att = jax.nn.sigmoid(att_logits)                               # (T, hwpad)

        # effective pooling weights G, built as a value (no scratch writes):
        #   row 2t   : a_t * prod_{s<t}(1 - a_s)   -> task-t feature
        #   row 2t+1 : prod_{s<=t}(1 - a_s)        -> non-task-t residual
        #   row 12   : final residual (= x_id)
        rows = []
        cum = jnp.ones((1, hwpad), jnp.float32)
        for t in range(NUM_TASKS):
            a_t = att[t:t + 1, :]
            rows.append(a_t * cum)
            cum = cum * (1.0 - a_t)
            rows.append(cum)
        rows.append(cum)
        rows.append(jnp.zeros((NHEADS_PAD - NHEADS, hwpad), jnp.float32))
        g = jnp.concatenate(rows, axis=0)                              # (16, hwpad)

        # GAP of all decomposed features as ONE MXU GEMM.
        pooled_list.append(
            jnp.dot(g.astype(jnp.bfloat16), feat_bf,
                    preferred_element_type=jnp.float32) * inv_hw)      # (16, C) f32

    p_all = pooled_list[0] if bimg == 1 else jnp.concatenate(pooled_list, axis=0)
    p_all = p_all.reshape(bimg, NHEADS_PAD, cfeat)                     # (bimg, 16, C)

    # ---- 13 heads: exploit block structure -> per-head GEMMs on stacked weights.
    out_rows = []
    for k in range(NHEADS):
        pk = p_all[:, k, :].astype(jnp.bfloat16)                       # (bimg, C)
        h = jnp.dot(pk, w1_ref[k], preferred_element_type=jnp.float32) + b1_ref[k]
        h = jnp.maximum(h, 0.0).astype(jnp.bfloat16)
        lg = jnp.dot(h, w2_ref[k], preferred_element_type=jnp.float32) + b2_ref[k]
        out_rows.append(lg.reshape(1, bimg, ncls_pad))
    out_rows.append(jnp.zeros((NHEADS_PAD - NHEADS, bimg, ncls_pad), jnp.float32))
    o_ref[0] = jnp.concatenate(out_rows, axis=0).astype(o_ref.dtype)   # single store


def _fused_call(x_col, params, *, bimg, hw, hwpad):
    batch, _, kstem = x_col.shape
    ng = batch // bimg
    cfeat = params["stem_w"].shape[1]
    hid = params["w1"].shape[2]
    ncls_pad = params["w2"].shape[2]
    ntask = params["att_w"].shape[0]

    kernel = partial(_mtl_fused_kernel, bimg=bimg, hw=hw, hwpad=hwpad)
    return pl.pallas_call(
        kernel,
        out_shape=jax.ShapeDtypeStruct((ng, NHEADS_PAD, bimg, ncls_pad), jnp.float32),
        grid=(ng,),
        in_specs=[
            pl.BlockSpec((bimg, hwpad, kstem), lambda g: (g, 0, 0)),     # im2col images
            pl.BlockSpec((kstem, cfeat), lambda g: (0, 0)),              # stem conv weights
            pl.BlockSpec((1, cfeat), lambda g: (0, 0)),                  # stem bias
            pl.BlockSpec((ntask, cfeat), lambda g: (0, 0)),              # attention weights
            pl.BlockSpec((ntask, 1), lambda g: (0, 0)),                  # attention bias
            pl.BlockSpec((NHEADS, cfeat, hid), lambda g: (0, 0, 0)),     # per-head W1
            pl.BlockSpec((NHEADS, 1, hid), lambda g: (0, 0, 0)),         # per-head b1
            pl.BlockSpec((NHEADS, hid, ncls_pad), lambda g: (0, 0, 0)),  # per-head W2
            pl.BlockSpec((NHEADS, 1, ncls_pad), lambda g: (0, 0, 0)),    # per-head b2
        ],
        out_specs=pl.BlockSpec((1, NHEADS_PAD, bimg, ncls_pad), lambda g: (g, 0, 0, 0)),
        compiler_params=pltpu.CompilerParams(
            dimension_semantics=("parallel",),
            vmem_limit_bytes=32 * 1024 * 1024,   # re-budget upward on v6e for large BIMG
        ),
    )(x_col, params["stem_w"], params["stem_b"], params["att_w"], params["att_b"],
      params["w1"], params["b1"], params["w2"], params["b2"])


# ----------------------------------------------------------------------------
# Parameter initialization (deterministic, in-script)
# ----------------------------------------------------------------------------
def init_params(key, num_classes, c_in=3, c_feat=128, hidden=128):
    head_ncls = _head_ncls(num_classes)
    ncls_pad = _round_up(max(head_ncls), 128)
    kstem = _round_up(9 * c_in, 8)

    keys = jax.random.split(key, 2 + 2 * NHEADS)
    ki = iter(range(len(keys)))
    nxt = lambda: keys[next(ki)]

    # 3x3 stem conv flattened for the im2col GEMM: row index = (di*3+dj)*c_in + c.
    stem_w = jax.random.normal(nxt(), (9 * c_in, c_feat), jnp.float32) / float(9 * c_in) ** 0.5
    stem_w = jnp.concatenate(
        [stem_w, jnp.zeros((kstem - 9 * c_in, c_feat), jnp.float32)], axis=0)
    stem_b = jnp.zeros((1, c_feat), jnp.float32)

    # 1x1 attention conv, stored transposed (T, c_feat).
    att_w = jax.random.normal(nxt(), (NUM_TASKS, c_feat), jnp.float32) / float(c_feat) ** 0.5
    att_b = jnp.zeros((NUM_TASKS, 1), jnp.float32)

    # per-head two-layer MLPs stacked head-major for per-head GEMMs in-kernel.
    w1 = jnp.stack([jax.random.normal(nxt(), (c_feat, hidden), jnp.float32)
                    / float(c_feat) ** 0.5 for _ in range(NHEADS)])
    b1 = jnp.zeros((NHEADS, 1, hidden), jnp.float32)
    w2 = []
    for k in range(NHEADS):
        ncls = head_ncls[k]
        wk = jnp.zeros((hidden, ncls_pad), jnp.float32)
        wk = wk.at[:, :ncls].set(
            jax.random.normal(nxt(), (hidden, ncls), jnp.float32) / float(hidden) ** 0.5)
        w2.append(wk)
    w2 = jnp.stack(w2)
    b2 = jnp.zeros((NHEADS, 1, ncls_pad), jnp.float32)

    return {
        "stem_w": stem_w.astype(jnp.bfloat16),
        "stem_b": stem_b,
        "att_w": att_w.astype(jnp.bfloat16),
        "att_b": att_b,
        "w1": w1.astype(jnp.bfloat16),
        "b1": b1,
        "w2": w2.astype(jnp.bfloat16),
        "b2": b2,
    }


# ----------------------------------------------------------------------------
# Full forward pass (mirrors MTLFaceRecognition.forward; GRL = identity)
# ----------------------------------------------------------------------------
@partial(jax.jit, static_argnames=("num_classes",))
def mtl_face_forward(params, x_nchw, num_classes):
    batch, c_in, H, W = x_nchw.shape
    head_ncls = _head_ncls(num_classes)
    ncls_pad = params["w2"].shape[2]
    kstem = params["stem_w"].shape[0]

    hw = H * W
    hwpad = _round_up(hw, 16)           # bf16 sublane-friendly spatial extent
    bimg = _choose_bimg(batch)

    # NCHW -> NHWC, im2col the 3x3 / padding=1 stem into a lane-dense slab
    # (merged taps + lane-dense layout; no separate mask input needed).
    x = jnp.transpose(x_nchw, (0, 2, 3, 1))
    xp = jnp.pad(x, ((0, 0), (1, 1), (1, 1), (0, 0)))
    cols = [xp[:, di:di + H, dj:dj + W, :] for di in range(3) for dj in range(3)]
    x_col = jnp.concatenate(cols, axis=-1).reshape(batch, hw, 9 * c_in)
    x_col = jnp.pad(x_col, ((0, 0), (0, hwpad - hw), (0, kstem - 9 * c_in)))
    x_col = x_col.astype(jnp.bfloat16)

    out4 = _fused_call(x_col, params, bimg=bimg, hw=hw, hwpad=hwpad)
    # (B//bimg, NHEADS_PAD, bimg, ncls_pad) -> (B, NHEADS_PAD, ncls_pad)
    out = jnp.transpose(out4, (0, 2, 1, 3)).reshape(batch, NHEADS_PAD, ncls_pad)

    def head(k):
        return out[:, k, :head_ncls[k]]

    x_spectacles, x_da_spectacles = head(0), head(1)
    x_occlusion, x_da_occlusion = head(2), head(3)
    x_facial_hair, x_da_facial_hair = head(4), head(5)
    x_emotion, x_da_emotion = head(6), head(7)
    x_pose, x_da_pose = head(8), head(9)
    x_gender, x_da_gender = head(10), head(11)      # da_gender consumes x_id (as in reference)
    x_id = head(12)

    logits = (
        (x_spectacles, x_da_spectacles),
        (x_occlusion, x_da_occlusion),
        (x_facial_hair, x_da_facial_hair),
        (x_pose, x_da_pose),
        (x_emotion, x_da_emotion),
        (x_gender, x_da_gender),
        x_id,
    )
    return logits


if __name__ == "__main__":
    key = jax.random.PRNGKey(0)
    k_param, k_x = jax.random.split(key)

    B, CIN, H, W = 2, 3, 16, 16
    NUM_CLASSES = 16

    params = init_params(k_param, NUM_CLASSES, c_in=CIN, c_feat=128, hidden=128)
    x = jax.random.normal(k_x, (B, CIN, H, W), jnp.float32)   # PyTorch-style NCHW input

    logits = mtl_face_forward(params, x, NUM_CLASSES)
    jax.block_until_ready(logits)

    # shape sanity checks
    assert logits[0][0].shape == (B, 2)                        # spectacles
    assert logits[3][0].shape == (B, 3)                        # pose
    assert logits[4][0].shape == (B, 7)                        # emotion
    assert logits[5][1].shape == (B, 2)                        # da_gender (on x_id)
    assert logits[6].shape == (B, NUM_CLASSES)                 # id
    print("KERNEL_OK")
</pallas_src>

<mosaic_0001>
module attributes {stable_mosaic.version = 11 : i64} {
  func.func @_mtl_fused_kernel(%arg0: i32, %arg1: memref<1x256x32xbf16, #tpu.memory_space<vmem>>, %arg2: memref<32x128xbf16, #tpu.memory_space<vmem>>, %arg3: memref<1x128xf32, #tpu.memory_space<vmem>>, %arg4: memref<6x128xbf16, #tpu.memory_space<vmem>>, %arg5: memref<6x1xf32, #tpu.memory_space<vmem>>, %arg6: memref<13x128x128xbf16, #tpu.memory_space<vmem>>, %arg7: memref<13x1x128xf32, #tpu.memory_space<vmem>>, %arg8: memref<13x128x128xbf16, #tpu.memory_space<vmem>>, %arg9: memref<13x1x128xf32, #tpu.memory_space<vmem>>, %arg10: memref<1x16x1x128xf32, #tpu.memory_space<vmem>>) attributes {dimension_semantics = [#tpu.dimension_semantics<parallel>], iteration_bounds = array<i64: 2>, scalar_prefetch = 0 : i64, scratch_operands = 0 : i64, tpu.core_type = #tpu.core_type<tc>, window_params = [{transform_indices = @transform_0, window_bounds = array<i64: 1, 256, 32>}, {pipeline_mode = #tpu.pipeline_mode<synchronous>, transform_indices = @transform_1, window_bounds = array<i64: 32, 128>}, {pipeline_mode = #tpu.pipeline_mode<synchronous>, transform_indices = @transform_2, window_bounds = array<i64: 1, 128>}, {pipeline_mode = #tpu.pipeline_mode<synchronous>, transform_indices = @transform_3, window_bounds = array<i64: 6, 128>}, {pipeline_mode = #tpu.pipeline_mode<synchronous>, transform_indices = @transform_4, window_bounds = array<i64: 6, 1>}, {pipeline_mode = #tpu.pipeline_mode<synchronous>, transform_indices = @transform_5, window_bounds = array<i64: 13, 128, 128>}, {pipeline_mode = #tpu.pipeline_mode<synchronous>, transform_indices = @transform_6, window_bounds = array<i64: 13, 1, 128>}, {pipeline_mode = #tpu.pipeline_mode<synchronous>, transform_indices = @transform_7, window_bounds = array<i64: 13, 128, 128>}, {pipeline_mode = #tpu.pipeline_mode<synchronous>, transform_indices = @transform_8, window_bounds = array<i64: 13, 1, 128>}, {transform_indices = @transform_9, window_bounds = array<i64: 1, 16, 1, 128>}]} {
    %c0 = arith.constant 0 : index
    %c0_0 = arith.constant 0 : index
    %c0_1 = arith.constant 0 : index
    %0 = vector.load %arg1[%c0, %c0_0, %c0_1] : memref<1x256x32xbf16, #tpu.memory_space<vmem>>, vector<1x256x32xbf16>
    %1 = vector.shape_cast %0 : vector<1x256x32xbf16> to vector<256x32xbf16>
    %c0_2 = arith.constant 0 : index
    %c0_3 = arith.constant 0 : index
    %2 = vector.load %arg2[%c0_2, %c0_3] : memref<32x128xbf16, #tpu.memory_space<vmem>>, vector<32x128xbf16>
    %cst = arith.constant dense<0.000000e+00> : vector<256x128xf32>
    %3 = tpu.matmul %1, %2, %cst {dimension_numbers = #tpu.dot_dimension_numbers<[1], [0], [0], [1], [0, 0, 1, 1], [], []>} : vector<256x32xbf16>, vector<32x128xbf16>, vector<256x128xf32> -> vector<256x128xf32>
    %c0_4 = arith.constant 0 : index
    %c0_5 = arith.constant 0 : index
    %4 = vector.load %arg3[%c0_4, %c0_5] : memref<1x128xf32, #tpu.memory_space<vmem>>, vector<1x128xf32>
    %5 = vector.broadcast %4 : vector<1x128xf32> to vector<256x128xf32>
    %6 = arith.addf %3, %5 : vector<256x128xf32>
    %cst_6 = arith.constant 0.000000e+00 : f32
    %7 = vector.broadcast %cst_6 : f32 to vector<256x128xf32>
    %8 = arith.maximumf %6, %7 : vector<256x128xf32>
    %9 = arith.truncf %8 : vector<256x128xf32> to vector<256x128xbf16>
    %c0_7 = arith.constant 0 : index
    %c0_8 = arith.constant 0 : index
    %10 = vector.load %arg4[%c0_7, %c0_8] : memref<6x128xbf16, #tpu.memory_space<vmem>>, vector<6x128xbf16>
    %cst_9 = arith.constant dense<0.000000e+00> : vector<6x256xf32>
    %11 = tpu.matmul %10, %9, %cst_9 {dimension_numbers = #tpu.dot_dimension_numbers<[1], [1], [0], [0], [0, 0, 1, 0], [], []>} : vector<6x128xbf16>, vector<256x128xbf16>, vector<6x256xf32> -> vector<6x256xf32>
    %c0_10 = arith.constant 0 : index
    %c0_11 = arith.constant 0 : index
    %12 = vector.load %arg5[%c0_10, %c0_11] : memref<6x1xf32, #tpu.memory_space<vmem>>, vector<6x1xf32>
    %13 = vector.broadcast %12 : vector<6x1xf32> to vector<6x256xf32>
    %14 = arith.addf %11, %13 : vector<6x256xf32>
    %15 = arith.negf %14 : vector<6x256xf32>
    %16 = math.exp %15 : vector<6x256xf32>
    %cst_12 = arith.constant 1.000000e+00 : f32
    %17 = vector.broadcast %cst_12 : f32 to vector<6x256xf32>
    %18 = arith.addf %17, %16 : vector<6x256xf32>
    %19 = arith.divf %17, %18 : vector<6x256xf32>
    %cst_13 = arith.constant 1.000000e+00 : f32
    %20 = vector.broadcast %cst_13 : f32 to vector<1x256xf32>
    %21 = vector.extract_strided_slice %19 {offsets = [0, 0], sizes = [1, 256], strides = [1, 1]} : vector<6x256xf32> to vector<1x256xf32>
    %22 = arith.mulf %21, %20 : vector<1x256xf32>
    %cst_14 = arith.constant 1.000000e+00 : f32
    %23 = vector.broadcast %cst_14 : f32 to vector<1x256xf32>
    %24 = arith.subf %23, %21 : vector<1x256xf32>
    %25 = arith.mulf %20, %24 : vector<1x256xf32>
    %26 = vector.extract_strided_slice %19 {offsets = [1, 0], sizes = [1, 256], strides = [1, 1]} : vector<6x256xf32> to vector<1x256xf32>
    %27 = arith.mulf %26, %25 : vector<1x256xf32>
    %cst_15 = arith.constant 1.000000e+00 : f32
    %28 = vector.broadcast %cst_15 : f32 to vector<1x256xf32>
    %29 = arith.subf %28, %26 : vector<1x256xf32>
    %30 = arith.mulf %25, %29 : vector<1x256xf32>
    %31 = vector.extract_strided_slice %19 {offsets = [2, 0], sizes = [1, 256], strides = [1, 1]} : vector<6x256xf32> to vector<1x256xf32>
    %32 = arith.mulf %31, %30 : vector<1x256xf32>
    %cst_16 = arith.constant 1.000000e+00 : f32
    %33 = vector.broadcast %cst_16 : f32 to vector<1x256xf32>
    %34 = arith.subf %33, %31 : vector<1x256xf32>
    %35 = arith.mulf %30, %34 : vector<1x256xf32>
    %36 = vector.extract_strided_slice %19 {offsets = [3, 0], sizes = [1, 256], strides = [1, 1]} : vector<6x256xf32> to vector<1x256xf32>
    %37 = arith.mulf %36, %35 : vector<1x256xf32>
    %cst_17 = arith.constant 1.000000e+00 : f32
    %38 = vector.broadcast %cst_17 : f32 to vector<1x256xf32>
    %39 = arith.subf %38, %36 : vector<1x256xf32>
    %40 = arith.mulf %35, %39 : vector<1x256xf32>
    %41 = vector.extract_strided_slice %19 {offsets = [4, 0], sizes = [1, 256], strides = [1, 1]} : vector<6x256xf32> to vector<1x256xf32>
    %42 = arith.mulf %41, %40 : vector<1x256xf32>
    %cst_18 = arith.constant 1.000000e+00 : f32
    %43 = vector.broadcast %cst_18 : f32 to vector<1x256xf32>
    %44 = arith.subf %43, %41 : vector<1x256xf32>
    %45 = arith.mulf %40, %44 : vector<1x256xf32>
    %46 = vector.extract_strided_slice %19 {offsets = [5, 0], sizes = [1, 256], strides = [1, 1]} : vector<6x256xf32> to vector<1x256xf32>
    %47 = arith.mulf %46, %45 : vector<1x256xf32>
    %cst_19 = arith.constant 1.000000e+00 : f32
    %48 = vector.broadcast %cst_19 : f32 to vector<1x256xf32>
    %49 = arith.subf %48, %46 : vector<1x256xf32>
    %50 = arith.mulf %45, %49 : vector<1x256xf32>
    %cst_20 = arith.constant 0.000000e+00 : f32
    %51 = vector.broadcast %cst_20 : f32 to vector<3x256xf32>
    %52 = tpu.concatenate %22, %25, %27, %30, %32, %35, %37, %40, %42, %45, %47, %50, %50, %51 in 0 : vector<1x256xf32>, vector<1x256xf32>, vector<1x256xf32>, vector<1x256xf32>, vector<1x256xf32>, vector<1x256xf32>, vector<1x256xf32>, vector<1x256xf32>, vector<1x256xf32>, vector<1x256xf32>, vector<1x256xf32>, vector<1x256xf32>, vector<1x256xf32>, vector<3x256xf32> -> vector<16x256xf32>
    %53 = arith.truncf %52 : vector<16x256xf32> to vector<16x256xbf16>
    %cst_21 = arith.constant dense<0.000000e+00> : vector<16x128xf32>
    %54 = tpu.matmul %53, %9, %cst_21 {dimension_numbers = #tpu.dot_dimension_numbers<[1], [0], [0], [1], [0, 0, 1, 1], [], []>} : vector<16x256xbf16>, vector<256x128xbf16>, vector<16x128xf32> -> vector<16x128xf32>
    %cst_22 = arith.constant 3.906250e-03 : f32
    %55 = vector.broadcast %cst_22 : f32 to vector<16x128xf32>
    %56 = arith.mulf %54, %55 : vector<16x128xf32>
    %57 = vector.shape_cast %56 : vector<16x128xf32> to vector<1x16x128xf32>
    %58 = vector.extract_strided_slice %57 {offsets = [0, 0, 0], sizes = [1, 1, 128], strides = [1, 1, 1]} : vector<1x16x128xf32> to vector<1x1x128xf32>
    %59 = vector.shape_cast %58 : vector<1x1x128xf32> to vector<1x128xf32>
    %60 = arith.truncf %59 : vector<1x128xf32> to vector<1x128xbf16>
    %c0_23 = arith.constant 0 : index
    %c0_24 = arith.constant 0 : index
    %c0_25 = arith.constant 0 : index
    %61 = vector.load %arg6[%c0_23, %c0_24, %c0_25] : memref<13x128x128xbf16, #tpu.memory_space<vmem>>, vector<1x128x128xbf16>
    %62 = vector.shape_cast %61 : vector<1x128x128xbf16> to vector<128x128xbf16>
    %cst_26 = arith.constant dense<0.000000e+00> : vector<1x128xf32>
    %63 = tpu.matmul %60, %62, %cst_26 {dimension_numbers = #tpu.dot_dimension_numbers<[1], [0], [0], [1], [0, 0, 1, 1], [], []>} : vector<1x128xbf16>, vector<128x128xbf16>, vector<1x128xf32> -> vector<1x128xf32>
    %c0_27 = arith.constant 0 : index
    %c0_28 = arith.constant 0 : index
    %c0_29 = arith.constant 0 : index
    %64 = vector.load %arg7[%c0_27, %c0_28, %c0_29] : memref<13x1x128xf32, #tpu.memory_space<vmem>>, vector<1x1x128xf32>
    %65 = vector.shape_cast %64 : vector<1x1x128xf32> to vector<1x128xf32>
    %66 = arith.addf %63, %65 : vector<1x128xf32>
    %cst_30 = arith.constant 0.000000e+00 : f32
    %67 = vector.broadcast %cst_30 : f32 to vector<1x128xf32>
    %68 = arith.maximumf %66, %67 : vector<1x128xf32>
    %69 = arith.truncf %68 : vector<1x128xf32> to vector<1x128xbf16>
    %c0_31 = arith.constant 0 : index
    %c0_32 = arith.constant 0 : index
    %c0_33 = arith.constant 0 : index
    %70 = vector.load %arg8[%c0_31, %c0_32, %c0_33] : memref<13x128x128xbf16, #tpu.memory_space<vmem>>, vector<1x128x128xbf16>
    %71 = vector.shape_cast %70 : vector<1x128x128xbf16> to vector<128x128xbf16>
    %cst_34 = arith.constant dense<0.000000e+00> : vector<1x128xf32>
    %72 = tpu.matmul %69, %71, %cst_34 {dimension_numbers = #tpu.dot_dimension_numbers<[1], [0], [0], [1], [0, 0, 1, 1], [], []>} : vector<1x128xbf16>, vector<128x128xbf16>, vector<1x128xf32> -> vector<1x128xf32>
    %c0_35 = arith.constant 0 : index
    %c0_36 = arith.constant 0 : index
    %c0_37 = arith.constant 0 : index
    %73 = vector.load %arg9[%c0_35, %c0_36, %c0_37] : memref<13x1x128xf32, #tpu.memory_space<vmem>>, vector<1x1x128xf32>
    %74 = vector.shape_cast %73 : vector<1x1x128xf32> to vector<1x128xf32>
    %75 = arith.addf %72, %74 : vector<1x128xf32>
    %76 = vector.shape_cast %75 : vector<1x128xf32> to vector<1x1x128xf32>
    %77 = vector.extract_strided_slice %57 {offsets = [0, 1, 0], sizes = [1, 1, 128], strides = [1, 1, 1]} : vector<1x16x128xf32> to vector<1x1x128xf32>
    %78 = vector.shape_cast %77 : vector<1x1x128xf32> to vector<1x128xf32>
    %79 = arith.truncf %78 : vector<1x128xf32> to vector<1x128xbf16>
    %c1 = arith.constant 1 : index
    %c0_38 = arith.constant 0 : index
    %c0_39 = arith.constant 0 : index
    %80 = vector.load %arg6[%c1, %c0_38, %c0_39] : memref<13x128x128xbf16, #tpu.memory_space<vmem>>, vector<1x128x128xbf16>
    %81 = vector.shape_cast %80 : vector<1x128x128xbf16> to vector<128x128xbf16>
    %cst_40 = arith.constant dense<0.000000e+00> : vector<1x128xf32>
    %82 = tpu.matmul %79, %81, %cst_40 {dimension_numbers = #tpu.dot_dimension_numbers<[1], [0], [0], [1], [0, 0, 1, 1], [], []>} : vector<1x128xbf16>, vector<128x128xbf16>, vector<1x128xf32> -> vector<1x128xf32>
    %c1_41 = arith.constant 1 : index
    %c0_42 = arith.constant 0 : index
    %c0_43 = arith.constant 0 : index
    %83 = vector.load %arg7[%c1_41, %c0_42, %c0_43] : memref<13x1x128xf32, #tpu.memory_space<vmem>>, vector<1x1x128xf32>
    %84 = vector.shape_cast %83 : vector<1x1x128xf32> to vector<1x128xf32>
    %85 = arith.addf %82, %84 : vector<1x128xf32>
    %cst_44 = arith.constant 0.000000e+00 : f32
    %86 = vector.broadcast %cst_44 : f32 to vector<1x128xf32>
    %87 = arith.maximumf %85, %86 : vector<1x128xf32>
    %88 = arith.truncf %87 : vector<1x128xf32> to vector<1x128xbf16>
    %c1_45 = arith.constant 1 : index
    %c0_46 = arith.constant 0 : index
    %c0_47 = arith.constant 0 : index
    %89 = vector.load %arg8[%c1_45, %c0_46, %c0_47] : memref<13x128x128xbf16, #tpu.memory_space<vmem>>, vector<1x128x128xbf16>
    %90 = vector.shape_cast %89 : vector<1x128x128xbf16> to vector<128x128xbf16>
    %cst_48 = arith.constant dense<0.000000e+00> : vector<1x128xf32>
    %91 = tpu.matmul %88, %90, %cst_48 {dimension_numbers = #tpu.dot_dimension_numbers<[1], [0], [0], [1], [0, 0, 1, 1], [], []>} : vector<1x128xbf16>, vector<128x128xbf16>, vector<1x128xf32> -> vector<1x128xf32>
    %c1_49 = arith.constant 1 : index
    %c0_50 = arith.constant 0 : index
    %c0_51 = arith.constant 0 : index
    %92 = vector.load %arg9[%c1_49, %c0_50, %c0_51] : memref<13x1x128xf32, #tpu.memory_space<vmem>>, vector<1x1x128xf32>
    %93 = vector.shape_cast %92 : vector<1x1x128xf32> to vector<1x128xf32>
    %94 = arith.addf %91, %93 : vector<1x128xf32>
    %95 = vector.shape_cast %94 : vector<1x128xf32> to vector<1x1x128xf32>
    %96 = vector.extract_strided_slice %57 {offsets = [0, 2, 0], sizes = [1, 1, 128], strides = [1, 1, 1]} : vector<1x16x128xf32> to vector<1x1x128xf32>
    %97 = vector.shape_cast %96 : vector<1x1x128xf32> to vector<1x128xf32>
    %98 = arith.truncf %97 : vector<1x128xf32> to vector<1x128xbf16>
    %c2 = arith.constant 2 : index
    %c0_52 = arith.constant 0 : index
    %c0_53 = arith.constant 0 : index
    %99 = vector.load %arg6[%c2, %c0_52, %c0_53] : memref<13x128x128xbf16, #tpu.memory_space<vmem>>, vector<1x128x128xbf16>
    %100 = vector.shape_cast %99 : vector<1x128x128xbf16> to vector<128x128xbf16>
    %cst_54 = arith.constant dense<0.000000e+00> : vector<1x128xf32>
    %101 = tpu.matmul %98, %100, %cst_54 {dimension_numbers = #tpu.dot_dimension_numbers<[1], [0], [0], [1], [0, 0, 1, 1], [], []>} : vector<1x128xbf16>, vector<128x128xbf16>, vector<1x128xf32> -> vector<1x128xf32>
    %c2_55 = arith.constant 2 : index
    %c0_56 = arith.constant 0 : index
    %c0_57 = arith.constant 0 : index
    %102 = vector.load %arg7[%c2_55, %c0_56, %c0_57] : memref<13x1x128xf32, #tpu.memory_space<vmem>>, vector<1x1x128xf32>
    %103 = vector.shape_cast %102 : vector<1x1x128xf32> to vector<1x128xf32>
    %104 = arith.addf %101, %103 : vector<1x128xf32>
    %cst_58 = arith.constant 0.000000e+00 : f32
    %105 = vector.broadcast %cst_58 : f32 to vector<1x128xf32>
    %106 = arith.maximumf %104, %105 : vector<1x128xf32>
    %107 = arith.truncf %106 : vector<1x128xf32> to vector<1x128xbf16>
    %c2_59 = arith.constant 2 : index
    %c0_60 = arith.constant 0 : index
    %c0_61 = arith.constant 0 : index
    %108 = vector.load %arg8[%c2_59, %c0_60, %c0_61] : memref<13x128x128xbf16, #tpu.memory_space<vmem>>, vector<1x128x128xbf16>
    %109 = vector.shape_cast %108 : vector<1x128x128xbf16> to vector<128x128xbf16>
    %cst_62 = arith.constant dense<0.000000e+00> : vector<1x128xf32>
    %110 = tpu.matmul %107, %109, %cst_62 {dimension_numbers = #tpu.dot_dimension_numbers<[1], [0], [0], [1], [0, 0, 1, 1], [], []>} : vector<1x128xbf16>, vector<128x128xbf16>, vector<1x128xf32> -> vector<1x128xf32>
    %c2_63 = arith.constant 2 : index
    %c0_64 = arith.constant 0 : index
    %c0_65 = arith.constant 0 : index
    %111 = vector.load %arg9[%c2_63, %c0_64, %c0_65] : memref<13x1x128xf32, #tpu.memory_space<vmem>>, vector<1x1x128xf32>
    %112 = vector.shape_cast %111 : vector<1x1x128xf32> to vector<1x128xf32>
    %113 = arith.addf %110, %112 : vector<1x128xf32>
    %114 = vector.shape_cast %113 : vector<1x128xf32> to vector<1x1x128xf32>
    %115 = vector.extract_strided_slice %57 {offsets = [0, 3, 0], sizes = [1, 1, 128], strides = [1, 1, 1]} : vector<1x16x128xf32> to vector<1x1x128xf32>
    %116 = vector.shape_cast %115 : vector<1x1x128xf32> to vector<1x128xf32>
    %117 = arith.truncf %116 : vector<1x128xf32> to vector<1x128xbf16>
    %c3 = arith.constant 3 : index
    %c0_66 = arith.constant 0 : index
    %c0_67 = arith.constant 0 : index
    %118 = vector.load %arg6[%c3, %c0_66, %c0_67] : memref<13x128x128xbf16, #tpu.memory_space<vmem>>, vector<1x128x128xbf16>
    %119 = vector.shape_cast %118 : vector<1x128x128xbf16> to vector<128x128xbf16>
    %cst_68 = arith.constant dense<0.000000e+00> : vector<1x128xf32>
    %120 = tpu.matmul %117, %119, %cst_68 {dimension_numbers = #tpu.dot_dimension_numbers<[1], [0], [0], [1], [0, 0, 1, 1], [], []>} : vector<1x128xbf16>, vector<128x128xbf16>, vector<1x128xf32> -> vector<1x128xf32>
    %c3_69 = arith.constant 3 : index
    %c0_70 = arith.constant 0 : index
    %c0_71 = arith.constant 0 : index
    %121 = vector.load %arg7[%c3_69, %c0_70, %c0_71] : memref<13x1x128xf32, #tpu.memory_space<vmem>>, vector<1x1x128xf32>
    %122 = vector.shape_cast %121 : vector<1x1x128xf32> to vector<1x128xf32>
    %123 = arith.addf %120, %122 : vector<1x128xf32>
    %cst_72 = arith.constant 0.000000e+00 : f32
    %124 = vector.broadcast %cst_72 : f32 to vector<1x128xf32>
    %125 = arith.maximumf %123, %124 : vector<1x128xf32>
    %126 = arith.truncf %125 : vector<1x128xf32> to vector<1x128xbf16>
    %c3_73 = arith.constant 3 : index
    %c0_74 = arith.constant 0 : index
    %c0_75 = arith.constant 0 : index
    %127 = vector.load %arg8[%c3_73, %c0_74, %c0_75] : memref<13x128x128xbf16, #tpu.memory_space<vmem>>, vector<1x128x128xbf16>
    %128 = vector.shape_cast %127 : vector<1x128x128xbf16> to vector<128x128xbf16>
    %cst_76 = arith.constant dense<0.000000e+00> : vector<1x128xf32>
    %129 = tpu.matmul %126, %128, %cst_76 {dimension_numbers = #tpu.dot_dimension_numbers<[1], [0], [0], [1], [0, 0, 1, 1], [], []>} : vector<1x128xbf16>, vector<128x128xbf16>, vector<1x128xf32> -> vector<1x128xf32>
    %c3_77 = arith.constant 3 : index
    %c0_78 = arith.constant 0 : index
    %c0_79 = arith.constant 0 : index
    %130 = vector.load %arg9[%c3_77, %c0_78, %c0_79] : memref<13x1x128xf32, #tpu.memory_space<vmem>>, vector<1x1x128xf32>
    %131 = vector.shape_cast %130 : vector<1x1x128xf32> to vector<1x128xf32>
    %132 = arith.addf %129, %131 : vector<1x128xf32>
    %133 = vector.shape_cast %132 : vector<1x128xf32> to vector<1x1x128xf32>
    %134 = vector.extract_strided_slice %57 {offsets = [0, 4, 0], sizes = [1, 1, 128], strides = [1, 1, 1]} : vector<1x16x128xf32> to vector<1x1x128xf32>
    %135 = vector.shape_cast %134 : vector<1x1x128xf32> to vector<1x128xf32>
    %136 = arith.truncf %135 : vector<1x128xf32> to vector<1x128xbf16>
    %c4 = arith.constant 4 : index
    %c0_80 = arith.constant 0 : index
    %c0_81 = arith.constant 0 : index
    %137 = vector.load %arg6[%c4, %c0_80, %c0_81] : memref<13x128x128xbf16, #tpu.memory_space<vmem>>, vector<1x128x128xbf16>
    %138 = vector.shape_cast %137 : vector<1x128x128xbf16> to vector<128x128xbf16>
    %cst_82 = arith.constant dense<0.000000e+00> : vector<1x128xf32>
    %139 = tpu.matmul %136, %138, %cst_82 {dimension_numbers = #tpu.dot_dimension_numbers<[1], [0], [0], [1], [0, 0, 1, 1], [], []>} : vector<1x128xbf16>, vector<128x128xbf16>, vector<1x128xf32> -> vector<1x128xf32>
    %c4_83 = arith.constant 4 : index
    %c0_84 = arith.constant 0 : index
    %c0_85 = arith.constant 0 : index
    %140 = vector.load %arg7[%c4_83, %c0_84, %c0_85] : memref<13x1x128xf32, #tpu.memory_space<vmem>>, vector<1x1x128xf32>
    %141 = vector.shape_cast %140 : vector<1x1x128xf32> to vector<1x128xf32>
    %142 = arith.addf %139, %141 : vector<1x128xf32>
    %cst_86 = arith.constant 0.000000e+00 : f32
    %143 = vector.broadcast %cst_86 : f32 to vector<1x128xf32>
    %144 = arith.maximumf %142, %143 : vector<1x128xf32>
    %145 = arith.truncf %144 : vector<1x128xf32> to vector<1x128xbf16>
    %c4_87 = arith.constant 4 : index
    %c0_88 = arith.constant 0 : index
    %c0_89 = arith.constant 0 : index
    %146 = vector.load %arg8[%c4_87, %c0_88, %c0_89] : memref<13x128x128xbf16, #tpu.memory_space<vmem>>, vector<1x128x128xbf16>
    %147 = vector.shape_cast %146 : vector<1x128x128xbf16> to vector<128x128xbf16>
    %cst_90 = arith.constant dense<0.000000e+00> : vector<1x128xf32>
    %148 = tpu.matmul %145, %147, %cst_90 {dimension_numbers = #tpu.dot_dimension_numbers<[1], [0], [0], [1], [0, 0, 1, 1], [], []>} : vector<1x128xbf16>, vector<128x128xbf16>, vector<1x128xf32> -> vector<1x128xf32>
    %c4_91 = arith.constant 4 : index
    %c0_92 = arith.constant 0 : index
    %c0_93 = arith.constant 0 : index
    %149 = vector.load %arg9[%c4_91, %c0_92, %c0_93] : memref<13x1x128xf32, #tpu.memory_space<vmem>>, vector<1x1x128xf32>
    %150 = vector.shape_cast %149 : vector<1x1x128xf32> to vector<1x128xf32>
    %151 = arith.addf %148, %150 : vector<1x128xf32>
    %152 = vector.shape_cast %151 : vector<1x128xf32> to vector<1x1x128xf32>
    %153 = vector.extract_strided_slice %57 {offsets = [0, 5, 0], sizes = [1, 1, 128], strides = [1, 1, 1]} : vector<1x16x128xf32> to vector<1x1x128xf32>
    %154 = vector.shape_cast %153 : vector<1x1x128xf32> to vector<1x128xf32>
    %155 = arith.truncf %154 : vector<1x128xf32> to vector<1x128xbf16>
    %c5 = arith.constant 5 : index
    %c0_94 = arith.constant 0 : index
    %c0_95 = arith.constant 0 : index
    %156 = vector.load %arg6[%c5, %c0_94, %c0_95] : memref<13x128x128xbf16, #tpu.memory_space<vmem>>, vector<1x128x128xbf16>
    %157 = vector.shape_cast %156 : vector<1x128x128xbf16> to vector<128x128xbf16>
    %cst_96 = arith.constant dense<0.000000e+00> : vector<1x128xf32>
    %158 = tpu.matmul %155, %157, %cst_96 {dimension_numbers = #tpu.dot_dimension_numbers<[1], [0], [0], [1], [0, 0, 1, 1], [], []>} : vector<1x128xbf16>, vector<128x128xbf16>, vector<1x128xf32> -> vector<1x128xf32>
    %c5_97 = arith.constant 5 : index
    %c0_98 = arith.constant 0 : index
    %c0_99 = arith.constant 0 : index
    %159 = vector.load %arg7[%c5_97, %c0_98, %c0_99] : memref<13x1x128xf32, #tpu.memory_space<vmem>>, vector<1x1x128xf32>
    %160 = vector.shape_cast %159 : vector<1x1x128xf32> to vector<1x128xf32>
    %161 = arith.addf %158, %160 : vector<1x128xf32>
    %cst_100 = arith.constant 0.000000e+00 : f32
    %162 = vector.broadcast %cst_100 : f32 to vector<1x128xf32>
    %163 = arith.maximumf %161, %162 : vector<1x128xf32>
    %164 = arith.truncf %163 : vector<1x128xf32> to vector<1x128xbf16>
    %c5_101 = arith.constant 5 : index
    %c0_102 = arith.constant 0 : index
    %c0_103 = arith.constant 0 : index
    %165 = vector.load %arg8[%c5_101, %c0_102, %c0_103] : memref<13x128x128xbf16, #tpu.memory_space<vmem>>, vector<1x128x128xbf16>
    %166 = vector.shape_cast %165 : vector<1x128x128xbf16> to vector<128x128xbf16>
    %cst_104 = arith.constant dense<0.000000e+00> : vector<1x128xf32>
    %167 = tpu.matmul %164, %166, %cst_104 {dimension_numbers = #tpu.dot_dimension_numbers<[1], [0], [0], [1], [0, 0, 1, 1], [], []>} : vector<1x128xbf16>, vector<128x128xbf16>, vector<1x128xf32> -> vector<1x128xf32>
    %c5_105 = arith.constant 5 : index
    %c0_106 = arith.constant 0 : index
    %c0_107 = arith.constant 0 : index
    %168 = vector.load %arg9[%c5_105, %c0_106, %c0_107] : memref<13x1x128xf32, #tpu.memory_space<vmem>>, vector<1x1x128xf32>
    %169 = vector.shape_cast %168 : vector<1x1x128xf32> to vector<1x128xf32>
    %170 = arith.addf %167, %169 : vector<1x128xf32>
    %171 = vector.shape_cast %170 : vector<1x128xf32> to vector<1x1x128xf32>
    %172 = vector.extract_strided_slice %57 {offsets = [0, 6, 0], sizes = [1, 1, 128], strides = [1, 1, 1]} : vector<1x16x128xf32> to vector<1x1x128xf32>
    %173 = vector.shape_cast %172 : vector<1x1x128xf32> to vector<1x128xf32>
    %174 = arith.truncf %173 : vector<1x128xf32> to vector<1x128xbf16>
    %c6 = arith.constant 6 : index
    %c0_108 = arith.constant 0 : index
    %c0_109 = arith.constant 0 : index
    %175 = vector.load %arg6[%c6, %c0_108, %c0_109] : memref<13x128x128xbf16, #tpu.memory_space<vmem>>, vector<1x128x128xbf16>
    %176 = vector.shape_cast %175 : vector<1x128x128xbf16> to vector<128x128xbf16>
    %cst_110 = arith.constant dense<0.000000e+00> : vector<1x128xf32>
    %177 = tpu.matmul %174, %176, %cst_110 {dimension_numbers = #tpu.dot_dimension_numbers<[1], [0], [0], [1], [0, 0, 1, 1], [], []>} : vector<1x128xbf16>, vector<128x128xbf16>, vector<1x128xf32> -> vector<1x128xf32>
    %c6_111 = arith.constant 6 : index
    %c0_112 = arith.constant 0 : index
    %c0_113 = arith.constant 0 : index
    %178 = vector.load %arg7[%c6_111, %c0_112, %c0_113] : memref<13x1x128xf32, #tpu.memory_space<vmem>>, vector<1x1x128xf32>
    %179 = vector.shape_cast %178 : vector<1x1x128xf32> to vector<1x128xf32>
    %180 = arith.addf %177, %179 : vector<1x128xf32>
    %cst_114 = arith.constant 0.000000e+00 : f32
    %181 = vector.broadcast %cst_114 : f32 to vector<1x128xf32>
    %182 = arith.maximumf %180, %181 : vector<1x128xf32>
    %183 = arith.truncf %182 : vector<1x128xf32> to vector<1x128xbf16>
    %c6_115 = arith.constant 6 : index
    %c0_116 = arith.constant 0 : index
    %c0_117 = arith.constant 0 : index
    %184 = vector.load %arg8[%c6_115, %c0_116, %c0_117] : memref<13x128x128xbf16, #tpu.memory_space<vmem>>, vector<1x128x128xbf16>
    %185 = vector.shape_cast %184 : vector<1x128x128xbf16> to vector<128x128xbf16>
    %cst_118 = arith.constant dense<0.000000e+00> : vector<1x128xf32>
    %186 = tpu.matmul %183, %185, %cst_118 {dimension_numbers = #tpu.dot_dimension_numbers<[1], [0], [0], [1], [0, 0, 1, 1], [], []>} : vector<1x128xbf16>, vector<128x128xbf16>, vector<1x128xf32> -> vector<1x128xf32>
    %c6_119 = arith.constant 6 : index
    %c0_120 = arith.constant 0 : index
    %c0_121 = arith.constant 0 : index
    %187 = vector.load %arg9[%c6_119, %c0_120, %c0_121] : memref<13x1x128xf32, #tpu.memory_space<vmem>>, vector<1x1x128xf32>
    %188 = vector.shape_cast %187 : vector<1x1x128xf32> to vector<1x128xf32>
    %189 = arith.addf %186, %188 : vector<1x128xf32>
    %190 = vector.shape_cast %189 : vector<1x128xf32> to vector<1x1x128xf32>
    %191 = vector.extract_strided_slice %57 {offsets = [0, 7, 0], sizes = [1, 1, 128], strides = [1, 1, 1]} : vector<1x16x128xf32> to vector<1x1x128xf32>
    %192 = vector.shape_cast %191 : vector<1x1x128xf32> to vector<1x128xf32>
    %193 = arith.truncf %192 : vector<1x128xf32> to vector<1x128xbf16>
    %c7 = arith.constant 7 : index
    %c0_122 = arith.constant 0 : index
    %c0_123 = arith.constant 0 : index
    %194 = vector.load %arg6[%c7, %c0_122, %c0_123] : memref<13x128x128xbf16, #tpu.memory_space<vmem>>, vector<1x128x128xbf16>
    %195 = vector.shape_cast %194 : vector<1x128x128xbf16> to vector<128x128xbf16>
    %cst_124 = arith.constant dense<0.000000e+00> : vector<1x128xf32>
    %196 = tpu.matmul %193, %195, %cst_124 {dimension_numbers = #tpu.dot_dimension_numbers<[1], [0], [0], [1], [0, 0, 1, 1], [], []>} : vector<1x128xbf16>, vector<128x128xbf16>, vector<1x128xf32> -> vector<1x128xf32>
    %c7_125 = arith.constant 7 : index
    %c0_126 = arith.constant 0 : index
    %c0_127 = arith.constant 0 : index
    %197 = vector.load %arg7[%c7_125, %c0_126, %c0_127] : memref<13x1x128xf32, #tpu.memory_space<vmem>>, vector<1x1x128xf32>
    %198 = vector.shape_cast %197 : vector<1x1x128xf32> to vector<1x128xf32>
    %199 = arith.addf %196, %198 : vector<1x128xf32>
    %cst_128 = arith.constant 0.000000e+00 : f32
    %200 = vector.broadcast %cst_128 : f32 to vector<1x128xf32>
    %201 = arith.maximumf %199, %200 : vector<1x128xf32>
    %202 = arith.truncf %201 : vector<1x128xf32> to vector<1x128xbf16>
    %c7_129 = arith.constant 7 : index
    %c0_130 = arith.constant 0 : index
    %c0_131 = arith.constant 0 : index
    %203 = vector.load %arg8[%c7_129, %c0_130, %c0_131] : memref<13x128x128xbf16, #tpu.memory_space<vmem>>, vector<1x128x128xbf16>
    %204 = vector.shape_cast %203 : vector<1x128x128xbf16> to vector<128x128xbf16>
    %cst_132 = arith.constant dense<0.000000e+00> : vector<1x128xf32>
    %205 = tpu.matmul %202, %204, %cst_132 {dimension_numbers = #tpu.dot_dimension_numbers<[1], [0], [0], [1], [0, 0, 1, 1], [], []>} : vector<1x128xbf16>, vector<128x128xbf16>, vector<1x128xf32> -> vector<1x128xf32>
    %c7_133 = arith.constant 7 : index
    %c0_134 = arith.constant 0 : index
    %c0_135 = arith.constant 0 : index
    %206 = vector.load %arg9[%c7_133, %c0_134, %c0_135] : memref<13x1x128xf32, #tpu.memory_space<vmem>>, vector<1x1x128xf32>
    %207 = vector.shape_cast %206 : vector<1x1x128xf32> to vector<1x128xf32>
    %208 = arith.addf %205, %207 : vector<1x128xf32>
    %209 = vector.shape_cast %208 : vector<1x128xf32> to vector<1x1x128xf32>
    %210 = vector.extract_strided_slice %57 {offsets = [0, 8, 0], sizes = [1, 1, 128], strides = [1, 1, 1]} : vector<1x16x128xf32> to vector<1x1x128xf32>
    %211 = vector.shape_cast %210 : vector<1x1x128xf32> to vector<1x128xf32>
    %212 = arith.truncf %211 : vector<1x128xf32> to vector<1x128xbf16>
    %c8 = arith.constant 8 : index
    %c0_136 = arith.constant 0 : index
    %c0_137 = arith.constant 0 : index
    %213 = vector.load %arg6[%c8, %c0_136, %c0_137] : memref<13x128x128xbf16, #tpu.memory_space<vmem>>, vector<1x128x128xbf16>
    %214 = vector.shape_cast %213 : vector<1x128x128xbf16> to vector<128x128xbf16>
    %cst_138 = arith.constant dense<0.000000e+00> : vector<1x128xf32>
    %215 = tpu.matmul %212, %214, %cst_138 {dimension_numbers = #tpu.dot_dimension_numbers<[1], [0], [0], [1], [0, 0, 1, 1], [], []>} : vector<1x128xbf16>, vector<128x128xbf16>, vector<1x128xf32> -> vector<1x128xf32>
    %c8_139 = arith.constant 8 : index
    %c0_140 = arith.constant 0 : index
    %c0_141 = arith.constant 0 : index
    %216 = vector.load %arg7[%c8_139, %c0_140, %c0_141] : memref<13x1x128xf32, #tpu.memory_space<vmem>>, vector<1x1x128xf32>
    %217 = vector.shape_cast %216 : vector<1x1x128xf32> to vector<1x128xf32>
    %218 = arith.addf %215, %217 : vector<1x128xf32>
    %cst_142 = arith.constant 0.000000e+00 : f32
    %219 = vector.broadcast %cst_142 : f32 to vector<1x128xf32>
    %220 = arith.maximumf %218, %219 : vector<1x128xf32>
    %221 = arith.truncf %220 : vector<1x128xf32> to vector<1x128xbf16>
    %c8_143 = arith.constant 8 : index
    %c0_144 = arith.constant 0 : index
    %c0_145 = arith.constant 0 : index
    %222 = vector.load %arg8[%c8_143, %c0_144, %c0_145] : memref<13x128x128xbf16, #tpu.memory_space<vmem>>, vector<1x128x128xbf16>
    %223 = vector.shape_cast %222 : vector<1x128x128xbf16> to vector<128x128xbf16>
    %cst_146 = arith.constant dense<0.000000e+00> : vector<1x128xf32>
    %224 = tpu.matmul %221, %223, %cst_146 {dimension_numbers = #tpu.dot_dimension_numbers<[1], [0], [0], [1], [0, 0, 1, 1], [], []>} : vector<1x128xbf16>, vector<128x128xbf16>, vector<1x128xf32> -> vector<1x128xf32>
    %c8_147 = arith.constant 8 : index
    %c0_148 = arith.constant 0 : index
    %c0_149 = arith.constant 0 : index
    %225 = vector.load %arg9[%c8_147, %c0_148, %c0_149] : memref<13x1x128xf32, #tpu.memory_space<vmem>>, vector<1x1x128xf32>
    %226 = vector.shape_cast %225 : vector<1x1x128xf32> to vector<1x128xf32>
    %227 = arith.addf %224, %226 : vector<1x128xf32>
    %228 = vector.shape_cast %227 : vector<1x128xf32> to vector<1x1x128xf32>
    %229 = vector.extract_strided_slice %57 {offsets = [0, 9, 0], sizes = [1, 1, 128], strides = [1, 1, 1]} : vector<1x16x128xf32> to vector<1x1x128xf32>
    %230 = vector.shape_cast %229 : vector<1x1x128xf32> to vector<1x128xf32>
    %231 = arith.truncf %230 : vector<1x128xf32> to vector<1x128xbf16>
    %c9 = arith.constant 9 : index
    %c0_150 = arith.constant 0 : index
    %c0_151 = arith.constant 0 : index
    %232 = vector.load %arg6[%c9, %c0_150, %c0_151] : memref<13x128x128xbf16, #tpu.memory_space<vmem>>, vector<1x128x128xbf16>
    %233 = vector.shape_cast %232 : vector<1x128x128xbf16> to vector<128x128xbf16>
    %cst_152 = arith.constant dense<0.000000e+00> : vector<1x128xf32>
    %234 = tpu.matmul %231, %233, %cst_152 {dimension_numbers = #tpu.dot_dimension_numbers<[1], [0], [0], [1], [0, 0, 1, 1], [], []>} : vector<1x128xbf16>, vector<128x128xbf16>, vector<1x128xf32> -> vector<1x128xf32>
    %c9_153 = arith.constant 9 : index
    %c0_154 = arith.constant 0 : index
    %c0_155 = arith.constant 0 : index
    %235 = vector.load %arg7[%c9_153, %c0_154, %c0_155] : memref<13x1x128xf32, #tpu.memory_space<vmem>>, vector<1x1x128xf32>
    %236 = vector.shape_cast %235 : vector<1x1x128xf32> to vector<1x128xf32>
    %237 = arith.addf %234, %236 : vector<1x128xf32>
    %cst_156 = arith.constant 0.000000e+00 : f32
    %238 = vector.broadcast %cst_156 : f32 to vector<1x128xf32>
    %239 = arith.maximumf %237, %238 : vector<1x128xf32>
    %240 = arith.truncf %239 : vector<1x128xf32> to vector<1x128xbf16>
    %c9_157 = arith.constant 9 : index
    %c0_158 = arith.constant 0 : index
    %c0_159 = arith.constant 0 : index
    %241 = vector.load %arg8[%c9_157, %c0_158, %c0_159] : memref<13x128x128xbf16, #tpu.memory_space<vmem>>, vector<1x128x128xbf16>
    %242 = vector.shape_cast %241 : vector<1x128x128xbf16> to vector<128x128xbf16>
    %cst_160 = arith.constant dense<0.000000e+00> : vector<1x128xf32>
    %243 = tpu.matmul %240, %242, %cst_160 {dimension_numbers = #tpu.dot_dimension_numbers<[1], [0], [0], [1], [0, 0, 1, 1], [], []>} : vector<1x128xbf16>, vector<128x128xbf16>, vector<1x128xf32> -> vector<1x128xf32>
    %c9_161 = arith.constant 9 : index
    %c0_162 = arith.constant 0 : index
    %c0_163 = arith.constant 0 : index
    %244 = vector.load %arg9[%c9_161, %c0_162, %c0_163] : memref<13x1x128xf32, #tpu.memory_space<vmem>>, vector<1x1x128xf32>
    %245 = vector.shape_cast %244 : vector<1x1x128xf32> to vector<1x128xf32>
    %246 = arith.addf %243, %245 : vector<1x128xf32>
    %247 = vector.shape_cast %246 : vector<1x128xf32> to vector<1x1x128xf32>
    %248 = vector.extract_strided_slice %57 {offsets = [0, 10, 0], sizes = [1, 1, 128], strides = [1, 1, 1]} : vector<1x16x128xf32> to vector<1x1x128xf32>
    %249 = vector.shape_cast %248 : vector<1x1x128xf32> to vector<1x128xf32>
    %250 = arith.truncf %249 : vector<1x128xf32> to vector<1x128xbf16>
    %c10 = arith.constant 10 : index
    %c0_164 = arith.constant 0 : index
    %c0_165 = arith.constant 0 : index
    %251 = vector.load %arg6[%c10, %c0_164, %c0_165] : memref<13x128x128xbf16, #tpu.memory_space<vmem>>, vector<1x128x128xbf16>
    %252 = vector.shape_cast %251 : vector<1x128x128xbf16> to vector<128x128xbf16>
    %cst_166 = arith.constant dense<0.000000e+00> : vector<1x128xf32>
    %253 = tpu.matmul %250, %252, %cst_166 {dimension_numbers = #tpu.dot_dimension_numbers<[1], [0], [0], [1], [0, 0, 1, 1], [], []>} : vector<1x128xbf16>, vector<128x128xbf16>, vector<1x128xf32> -> vector<1x128xf32>
    %c10_167 = arith.constant 10 : index
    %c0_168 = arith.constant 0 : index
    %c0_169 = arith.constant 0 : index
    %254 = vector.load %arg7[%c10_167, %c0_168, %c0_169] : memref<13x1x128xf32, #tpu.memory_space<vmem>>, vector<1x1x128xf32>
    %255 = vector.shape_cast %254 : vector<1x1x128xf32> to vector<1x128xf32>
    %256 = arith.addf %253, %255 : vector<1x128xf32>
    %cst_170 = arith.constant 0.000000e+00 : f32
    %257 = vector.broadcast %cst_170 : f32 to vector<1x128xf32>
    %258 = arith.maximumf %256, %257 : vector<1x128xf32>
    %259 = arith.truncf %258 : vector<1x128xf32> to vector<1x128xbf16>
    %c10_171 = arith.constant 10 : index
    %c0_172 = arith.constant 0 : index
    %c0_173 = arith.constant 0 : index
    %260 = vector.load %arg8[%c10_171, %c0_172, %c0_173] : memref<13x128x128xbf16, #tpu.memory_space<vmem>>, vector<1x128x128xbf16>
    %261 = vector.shape_cast %260 : vector<1x128x128xbf16> to vector<128x128xbf16>
    %cst_174 = arith.constant dense<0.000000e+00> : vector<1x128xf32>
    %262 = tpu.matmul %259, %261, %cst_174 {dimension_numbers = #tpu.dot_dimension_numbers<[1], [0], [0], [1], [0, 0, 1, 1], [], []>} : vector<1x128xbf16>, vector<128x128xbf16>, vector<1x128xf32> -> vector<1x128xf32>
    %c10_175 = arith.constant 10 : index
    %c0_176 = arith.constant 0 : index
    %c0_177 = arith.constant 0 : index
    %263 = vector.load %arg9[%c10_175, %c0_176, %c0_177] : memref<13x1x128xf32, #tpu.memory_space<vmem>>, vector<1x1x128xf32>
    %264 = vector.shape_cast %263 : vector<1x1x128xf32> to vector<1x128xf32>
    %265 = arith.addf %262, %264 : vector<1x128xf32>
    %266 = vector.shape_cast %265 : vector<1x128xf32> to vector<1x1x128xf32>
    %267 = vector.extract_strided_slice %57 {offsets = [0, 11, 0], sizes = [1, 1, 128], strides = [1, 1, 1]} : vector<1x16x128xf32> to vector<1x1x128xf32>
    %268 = vector.shape_cast %267 : vector<1x1x128xf32> to vector<1x128xf32>
    %269 = arith.truncf %268 : vector<1x128xf32> to vector<1x128xbf16>
    %c11 = arith.constant 11 : index
    %c0_178 = arith.constant 0 : index
    %c0_179 = arith.constant 0 : index
    %270 = vector.load %arg6[%c11, %c0_178, %c0_179] : memref<13x128x128xbf16, #tpu.memory_space<vmem>>, vector<1x128x128xbf16>
    %271 = vector.shape_cast %270 : vector<1x128x128xbf16> to vector<128x128xbf16>
    %cst_180 = arith.constant dense<0.000000e+00> : vector<1x128xf32>
    %272 = tpu.matmul %269, %271, %cst_180 {dimension_numbers = #tpu.dot_dimension_numbers<[1], [0], [0], [1], [0, 0, 1, 1], [], []>} : vector<1x128xbf16>, vector<128x128xbf16>, vector<1x128xf32> -> vector<1x128xf32>
    %c11_181 = arith.constant 11 : index
    %c0_182 = arith.constant 0 : index
    %c0_183 = arith.constant 0 : index
    %273 = vector.load %arg7[%c11_181, %c0_182, %c0_183] : memref<13x1x128xf32, #tpu.memory_space<vmem>>, vector<1x1x128xf32>
    %274 = vector.shape_cast %273 : vector<1x1x128xf32> to vector<1x128xf32>
    %275 = arith.addf %272, %274 : vector<1x128xf32>
    %cst_184 = arith.constant 0.000000e+00 : f32
    %276 = vector.broadcast %cst_184 : f32 to vector<1x128xf32>
    %277 = arith.maximumf %275, %276 : vector<1x128xf32>
    %278 = arith.truncf %277 : vector<1x128xf32> to vector<1x128xbf16>
    %c11_185 = arith.constant 11 : index
    %c0_186 = arith.constant 0 : index
    %c0_187 = arith.constant 0 : index
    %279 = vector.load %arg8[%c11_185, %c0_186, %c0_187] : memref<13x128x128xbf16, #tpu.memory_space<vmem>>, vector<1x128x128xbf16>
    %280 = vector.shape_cast %279 : vector<1x128x128xbf16> to vector<128x128xbf16>
    %cst_188 = arith.constant dense<0.000000e+00> : vector<1x128xf32>
    %281 = tpu.matmul %278, %280, %cst_188 {dimension_numbers = #tpu.dot_dimension_numbers<[1], [0], [0], [1], [0, 0, 1, 1], [], []>} : vector<1x128xbf16>, vector<128x128xbf16>, vector<1x128xf32> -> vector<1x128xf32>
    %c11_189 = arith.constant 11 : index
    %c0_190 = arith.constant 0 : index
    %c0_191 = arith.constant 0 : index
    %282 = vector.load %arg9[%c11_189, %c0_190, %c0_191] : memref<13x1x128xf32, #tpu.memory_space<vmem>>, vector<1x1x128xf32>
    %283 = vector.shape_cast %282 : vector<1x1x128xf32> to vector<1x128xf32>
    %284 = arith.addf %281, %283 : vector<1x128xf32>
    %285 = vector.shape_cast %284 : vector<1x128xf32> to vector<1x1x128xf32>
    %286 = vector.extract_strided_slice %57 {offsets = [0, 12, 0], sizes = [1, 1, 128], strides = [1, 1, 1]} : vector<1x16x128xf32> to vector<1x1x128xf32>
    %287 = vector.shape_cast %286 : vector<1x1x128xf32> to vector<1x128xf32>
    %288 = arith.truncf %287 : vector<1x128xf32> to vector<1x128xbf16>
    %c12 = arith.constant 12 : index
    %c0_192 = arith.constant 0 : index
    %c0_193 = arith.constant 0 : index
    %289 = vector.load %arg6[%c12, %c0_192, %c0_193] : memref<13x128x128xbf16, #tpu.memory_space<vmem>>, vector<1x128x128xbf16>
    %290 = vector.shape_cast %289 : vector<1x128x128xbf16> to vector<128x128xbf16>
    %cst_194 = arith.constant dense<0.000000e+00> : vector<1x128xf32>
    %291 = tpu.matmul %288, %290, %cst_194 {dimension_numbers = #tpu.dot_dimension_numbers<[1], [0], [0], [1], [0, 0, 1, 1], [], []>} : vector<1x128xbf16>, vector<128x128xbf16>, vector<1x128xf32> -> vector<1x128xf32>
    %c12_195 = arith.constant 12 : index
    %c0_196 = arith.constant 0 : index
    %c0_197 = arith.constant 0 : index
    %292 = vector.load %arg7[%c12_195, %c0_196, %c0_197] : memref<13x1x128xf32, #tpu.memory_space<vmem>>, vector<1x1x128xf32>
    %293 = vector.shape_cast %292 : vector<1x1x128xf32> to vector<1x128xf32>
    %294 = arith.addf %291, %293 : vector<1x128xf32>
    %cst_198 = arith.constant 0.000000e+00 : f32
    %295 = vector.broadcast %cst_198 : f32 to vector<1x128xf32>
    %296 = arith.maximumf %294, %295 : vector<1x128xf32>
    %297 = arith.truncf %296 : vector<1x128xf32> to vector<1x128xbf16>
    %c12_199 = arith.constant 12 : index
    %c0_200 = arith.constant 0 : index
    %c0_201 = arith.constant 0 : index
    %298 = vector.load %arg8[%c12_199, %c0_200, %c0_201] : memref<13x128x128xbf16, #tpu.memory_space<vmem>>, vector<1x128x128xbf16>
    %299 = vector.shape_cast %298 : vector<1x128x128xbf16> to vector<128x128xbf16>
    %cst_202 = arith.constant dense<0.000000e+00> : vector<1x128xf32>
    %300 = tpu.matmul %297, %299, %cst_202 {dimension_numbers = #tpu.dot_dimension_numbers<[1], [0], [0], [1], [0, 0, 1, 1], [], []>} : vector<1x128xbf16>, vector<128x128xbf16>, vector<1x128xf32> -> vector<1x128xf32>
    %c12_203 = arith.constant 12 : index
    %c0_204 = arith.constant 0 : index
    %c0_205 = arith.constant 0 : index
    %301 = vector.load %arg9[%c12_203, %c0_204, %c0_205] : memref<13x1x128xf32, #tpu.memory_space<vmem>>, vector<1x1x128xf32>
    %302 = vector.shape_cast %301 : vector<1x1x128xf32> to vector<1x128xf32>
    %303 = arith.addf %300, %302 : vector<1x128xf32>
    %304 = vector.shape_cast %303 : vector<1x128xf32> to vector<1x1x128xf32>
    %cst_206 = arith.constant 0.000000e+00 : f32
    %305 = vector.broadcast %cst_206 : f32 to vector<3x1x128xf32>
    %306 = tpu.concatenate %76, %95, %114, %133, %152, %171, %190, %209, %228, %247, %266, %285, %304, %305 in 0 : vector<1x1x128xf32>, vector<1x1x128xf32>, vector<1x1x128xf32>, vector<1x1x128xf32>, vector<1x1x128xf32>, vector<1x1x128xf32>, vector<1x1x128xf32>, vector<1x1x128xf32>, vector<1x1x128xf32>, vector<1x1x128xf32>, vector<1x1x128xf32>, vector<1x1x128xf32>, vector<1x1x128xf32>, vector<3x1x128xf32> -> vector<16x1x128xf32>
    %c0_207 = arith.constant 0 : index
    %c0_208 = arith.constant 0 : index
    %c0_209 = arith.constant 0 : index
    %c0_210 = arith.constant 0 : index
    %307 = vector.load %arg10[%c0_207, %c0_208, %c0_209, %c0_210] : memref<1x16x1x128xf32, #tpu.memory_space<vmem>>, vector<1x16x1x128xf32>
    %308 = vector.shape_cast %307 : vector<1x16x1x128xf32> to vector<16x1x128xf32>
    %309 = vector.shape_cast %306 : vector<16x1x128xf32> to vector<1x16x1x128xf32>
    tpu.vector_store %arg10[%c0_207, %c0_208, %c0_209, %c0_210], %309 {strides = array<i32>} : memref<1x16x1x128xf32, #tpu.memory_space<vmem>>, vector<1x16x1x128xf32>,
    return
  }
  func.func @transform_0(%arg0: i32) -> (i32, i32, i32) {
    %c0_i32 = arith.constant 0 : i32
    %c0_i32_0 = arith.constant 0 : i32
    %c0_i32_1 = arith.constant 0 : i32
    return %arg0, %c0_i32, %c0_i32_0 : i32, i32, i32
  }
  func.func @transform_1(%arg0: i32) -> (i32, i32) {
    %c0_i32 = arith.constant 0 : i32
    %c0_i32_0 = arith.constant 0 : i32
    %c0_i32_1 = arith.constant 0 : i32
    return %c0_i32, %c0_i32_0 : i32, i32
  }
  func.func @transform_2(%arg0: i32) -> (i32, i32) {
    %c0_i32 = arith.constant 0 : i32
    %c0_i32_0 = arith.constant 0 : i32
    %c0_i32_1 = arith.constant 0 : i32
    return %c0_i32, %c0_i32_0 : i32, i32
  }
  func.func @transform_3(%arg0: i32) -> (i32, i32) {
    %c0_i32 = arith.constant 0 : i32
    %c0_i32_0 = arith.constant 0 : i32
    %c0_i32_1 = arith.constant 0 : i32
    return %c0_i32, %c0_i32_0 : i32, i32
  }
  func.func @transform_4(%arg0: i32) -> (i32, i32) {
    %c0_i32 = arith.constant 0 : i32
    %c0_i32_0 = arith.constant 0 : i32
    %c0_i32_1 = arith.constant 0 : i32
    return %c0_i32, %c0_i32_0 : i32, i32
  }
  func.func @transform_5(%arg0: i32) -> (i32, i32, i32) {
    %c0_i32 = arith.constant 0 : i32
    %c0_i32_0 = arith.constant 0 : i32
    %c0_i32_1 = arith.constant 0 : i32
    %c0_i32_2 = arith.constant 0 : i32
    return %c0_i32, %c0_i32_0, %c0_i32_1 : i32, i32, i32
  }
  func.func @transform_6(%arg0: i32) -> (i32, i32, i32) {
    %c0_i32 = arith.constant 0 : i32
    %c0_i32_0 = arith.constant 0 : i32
    %c0_i32_1 = arith.constant 0 : i32
    %c0_i32_2 = arith.constant 0 : i32
    return %c0_i32, %c0_i32_0, %c0_i32_1 : i32, i32, i32
  }
  func.func @transform_7(%arg0: i32) -> (i32, i32, i32) {
    %c0_i32 = arith.constant 0 : i32
    %c0_i32_0 = arith.constant 0 : i32
    %c0_i32_1 = arith.constant 0 : i32
    %c0_i32_2 = arith.constant 0 : i32
    return %c0_i32, %c0_i32_0, %c0_i32_1 : i32, i32, i32
  }
  func.func @transform_8(%arg0: i32) -> (i32, i32, i32) {
    %c0_i32 = arith.constant 0 : i32
    %c0_i32_0 = arith.constant 0 : i32
    %c0_i32_1 = arith.constant 0 : i32
    %c0_i32_2 = arith.constant 0 : i32
    return %c0_i32, %c0_i32_0, %c0_i32_1 : i32, i32, i32
  }
  func.func @transform_9(%arg0: i32) -> (i32, i32, i32, i32) {
    %c0_i32 = arith.constant 0 : i32
    %c0_i32_0 = arith.constant 0 : i32
    %c0_i32_1 = arith.constant 0 : i32
    %c0_i32_2 = arith.constant 0 : i32
    return %arg0, %c0_i32, %c0_i32_0, %c0_i32_1 : i32, i32, i32, i32
  }
}

</mosaic_0001>

<bundles_post_ra>
// kernel: mtl_face_forward.1
= control target key start
LH: loop header
LB: loop body
LE: loop exit
PB: predicated region body
PF: predicated region fallthrough
CT: control target
= control target key end

     0   :  { %s5719_s30 = smov 0   ;;  %s6917_s0 = inlined_call_operand.vmem [shape: bf16[2,256,32], index: 0, kind: input, shape index: {}]   ;;  %s6918_s1 = inlined_call_operand.vmem [shape: bf16[32,128], index: 1, kind: input, shape index: {}]   ;;  %s6919_s2 = inlined_call_operand.vmem [shape: f32[1,128], index: 2, kind: input, shape index: {}]   ;;  %s6920_s3 = inlined_call_operand.vmem [shape: bf16[6,128], index: 3, kind: input, shape index: {}]   ;;  %s6921_s4 = inlined_call_operand.vmem [shape: f32[6,1], index: 4, kind: input, shape index: {}]   ;;  %s6922_s5 = inlined_call_operand.vmem [shape: bf16[13,128,128], index: 5, kind: input, shape index: {}]   ;;  %s6923_s6 = inlined_call_operand.vmem [shape: f32[13,1,128], index: 6, kind: input, shape index: {}]   ;;  %s6924_s7 = inlined_call_operand.vmem [shape: bf16[13,128,128], index: 7, kind: input, shape index: {}]   ;;  %s6925_s8 = inlined_call_operand.vmem [shape: f32[13,1,128], index: 8, kind: input, shape index: {}]   ;;  %s6926_s9 = inlined_call_operand.vmem [shape: f32[2,16,1,128], index: 9, kind: output, shape index: {}]  }
   0x1 LB: > { %s3892_s10 = sadd.s32 4294967295, %s5663_s30   ;;  %p3896_p0 = scmp.ge.s32.totalorder %s5663_s30, 1  ;;  %s5663_s30 = sphi %s5719_s30, %s19_s30  }
   0x2   : > { %p287_p1 = scmp.lt.s32.totalorder %s5663_s30, 3 }
   0x4   : > { %p288_p2 = pnand %p3896_p0, %p287_p1 }
   0x5   : > { %p322_p3 = scmp.lt.s32.totalorder (!%p288_p2), %s3892_s10, 1 }
   0x6   : > { %291 = sbr.rel (%p288_p2) target bundleno = 1580 (0x62c), region = 56 }
   0xb   : > { %v5423_v0 = vld [vmem:[%s6918_s1 + $0x8] sm:$0xff]   ;;  %v5424_v1 = vld [vmem:[%s6918_s1] sm:$0xff]   ;;  %s6928_s10 = smov (!%p322_p3, %s3892_s10), 1  ;;  %vm467_vm0 = vcmask 261120   ;;  %v5665_v25 = vmov 0   ;;  %vm913_vm1 = vcmask 1040384  }
   0xc   : > { %4854 = vmatprep.subr.bf16.mxu0 %v5423_v0  ;;  %s4561_s15 = sshll.u32 %s6928_s10, 7  ;;  %v5776_v18 = vld [vmem:[%s6920_s3] sm:$0x7]  ;;  %5422 = vset.pattern.permute.xlu0 %v5665_v25  ;;  %vm916_vm2 = vcmask 1041408   ;;  %vm919_vm3 = vcmask 1042432   ;;  %vm922_vm4 = vcmask 1043456  }
   0xd   : > { %4855 = vmatpush3.bf16.msra.mxu0 %v5423_v0  ;;  %s5739_s18 = scalar_lea.vmem %s6917_s0, %s4561_s15  ;;  %4596 = vmatprep.mubr.bf16.mxu1 %v5776_v18  ;;  %v5782_v20 = vld [vmem:[%s6919_s2] ss:$0 sm:$0xff]  ;;  %vm925_vm5 = vcmask 1044480   ;;  %vm928_vm6 = vcmask 1045504   ;;  %vm931_vm7 = vcmask 1046528   ;;  %vm5667_vm8 = vmmov 1  }
   0xe   : > { %4856 = vmatprep.subr.bf16.mxu0 %v5424_v1  ;;  %v5425_v2 = vld [vmem:[%s5739_s18] sm:$0xff]   ;;  %v5426_v3 = vld [vmem:[%s5739_s18 + $0x8] sm:$0xff]   ;;  %v5427_v4 = vld [vmem:[%s5739_s18 + $0x10] sm:$0xff]   ;;  %vm5668_vm10 = vmmov 0   ;;  %s3899_s22 = sshll.u32 %s6928_s10, 4 }
   0xf   : > { %4858 = vmatprep.mubr.msk.bf16.mxu0 %vm467_vm0, %v5425_v2  ;;  %v5428_v5 = vld [vmem:[%s5739_s18 + $0x18] sm:$0xff]   ;;  %v5429_v6 = vld [vmem:[%s5739_s18 + $0x20] sm:$0xff]   ;;  %v5430_v7 = vld [vmem:[%s5739_s18 + $0x28] sm:$0xff]   ;;  %s6364_s27 = scalar_lea.vmem %s6926_s9, %s3899_s22 }
  0x10   : > { %v5431_v8 = vld [vmem:[%s5739_s18 + $0x30] sm:$0xff]   ;;  %v5432_v9 = vld [vmem:[%s5739_s18 + $0x38] sm:$0xff]   ;;  %v5433_v10 = vld [vmem:[%s5739_s18 + $0x40] sm:$0xff]  }
  0x11   : > { %4857 = vmatpush3.bf16.msra.mxu0 %v5424_v1  ;;  %v5434_v11 = vld [vmem:[%s5739_s18 + $0x48] sm:$0xff]   ;;  %v5435_v12 = vld [vmem:[%s5739_s18 + $0x50] sm:$0xff]   ;;  %v5436_v13 = vld [vmem:[%s5739_s18 + $0x58] sm:$0xff]  }
  0x12   : > { %v5437_v14 = vld [vmem:[%s5739_s18 + $0x60] sm:$0xff]   ;;  %v5438_v15 = vld [vmem:[%s5739_s18 + $0x68] sm:$0xff]   ;;  %v5439_v16 = vld [vmem:[%s5739_s18 + $0x70] sm:$0xff]  }
  0x13   : > { %v5440_v17 = vld [vmem:[%s5739_s18 + $0x78] sm:$0xff]   ;;  %v726_v23 = vld [vmem:[%s6921_s4] sm:$0x3f]  ;;  %vm3937_vm9 = vmpackc.low %vm925_vm5, %vm5667_vm8 }
  0x14   : > { %4859 = vmatmul.mubr.msk.bf16.vlgmr.msra.gmra.mxu0 %vm467_vm0, %v5426_v3  ;;  %729 = vperm.xlu0 %5422, %v726_v23  }
  0x15   : > { %4862 = vmatprep.mubr.msk.bf16.mxu0 %vm467_vm0, %v5427_v4 }
  0x1c   : > { %4863 = vmatmul.mubr.msk.bf16.gmra.mxu0 %vm467_vm0, %v5428_v5 }
  0x1d   : > { %4866 = vmatprep.mubr.msk.bf16.mxu0 %vm467_vm0, %v5429_v6 }
  0x24   : > { %4867 = vmatmul.mubr.msk.bf16.gmra.mxu0 %vm467_vm0, %v5430_v7 }
  0x25   : > { %4870 = vmatprep.mubr.msk.bf16.mxu0 %vm467_vm0, %v5431_v8 }
  0x2c   : > { %4871 = vmatmul.mubr.msk.bf16.gmra.mxu0 %vm467_vm0, %v5432_v9 }
  0x2d   : > { %4874 = vmatprep.mubr.msk.bf16.mxu0 %vm467_vm0, %v5433_v10 }
  0x34   : > { %4875 = vmatmul.mubr.msk.bf16.gmra.mxu0 %vm467_vm0, %v5434_v11 }
  0x35   : > { %4878 = vmatprep.mubr.msk.bf16.mxu0 %vm467_vm0, %v5435_v12 }
  0x3c   : > { %4879 = vmatmul.mubr.msk.bf16.gmra.mxu0 %vm467_vm0, %v5436_v13 }
  0x3d   : > { %4882 = vmatprep.mubr.msk.bf16.mxu0 %vm467_vm0, %v5437_v14 }
  0x44   : > { %4883 = vmatmul.mubr.msk.bf16.gmra.mxu0 %vm467_vm0, %v5438_v15 }
  0x45   : > { %4886 = vmatprep.mubr.msk.bf16.mxu0 %vm467_vm0, %v5439_v16 }
  0x4c   : > { %4887 = vmatmul.mubr.msk.bf16.gmra.mxu0 %vm467_vm0, %v5440_v17 }
  0xd4   : > { %v4860_v19 = vpop.f32.mrf.mxu0 }
  0xd5   : > { %v559_v22 = vadd.f32 %v4860_v19, %v5782_v20 }
  0xd6   : > { %v550_v21 = vpop.f32.mrf.mxu0 }
  0xd7   : > { %v551_v26 = vadd.f32 %v5782_v20, %v550_v21  ;;  %v679_v29 = vmax.f32 %v559_v22, 0.0 }
  0xd8   : > { %v4861_v24 = vpop.f32.mrf.mxu0 }
  0xd9   : > { %v562_v27 = vadd.f32 %v4861_v24, %v5782_v20  ;;  %v677_v33 = vmax.f32 %v551_v26, 0.0 }
  0xda   : > { %v553_v28 = vpop.f32.mrf.mxu0 }
  0xdb   : > { %v680_v30 = vmax.f32 %v562_v27, 0.0  ;;  %v554_v31 = vadd.f32 %v5782_v20, %v553_v28 }
  0xdc   : > { %v4864_v32 = vpop.f32.mrf.mxu0 }
  0xdd   : > { %v5791_v34 = vpack.c.bf16 %v680_v30, %v679_v29  ;;  %v678_v35 = vmax.f32 %v554_v31, 0.0  ;;  %v575_v38 = vadd.f32 %v4864_v32, %v5782_v20 }
  0xde   : > { %v566_v36 = vpop.f32.mrf.mxu0 }
  0xdf   : > { %v5793_v37 = vpack.c.bf16 %v678_v35, %v677_v33  ;;  %v567_v40 = vadd.f32 %v5782_v20, %v566_v36  ;;  %v683_v43 = vmax.f32 %v575_v38, 0.0 }
  0xe0   : > { %v4865_v39 = vpop.f32.mrf.mxu0 }
  0xe1   : > { %v578_v41 = vadd.f32 %v4865_v39, %v5782_v20  ;;  %v681_v47 = vmax.f32 %v567_v40, 0.0 }
  0xe2   : > { %v569_v42 = vpop.f32.mrf.mxu0 }
  0xe3   : > { %v684_v44 = vmax.f32 %v578_v41, 0.0  ;;  %v570_v45 = vadd.f32 %v5782_v20, %v569_v42 }
  0xe4   : > { %v4868_v46 = vpop.f32.mrf.mxu0 }
  0xe5   : > { %v5799_v48 = vpack.c.bf16 %v684_v44, %v683_v43  ;;  %v682_v49 = vmax.f32 %v570_v45, 0.0  ;;  %v591_v36 = vadd.f32 %v4868_v46, %v5782_v20 }
  0xe6   : > { %v5801_v50 = vpop.f32.mrf.mxu0 }
  0xe7   : > { %v5803_v51 = vpack.c.bf16 %v682_v49, %v681_v47  ;;  %v687_v49 = vmax.f32 %v591_v36, 0.0  ;;  %v583_v46 = vadd.f32 %v5782_v20, %v5801_v50 }
  0xe8   : > { %v4869_v52 = vpop.f32.mrf.mxu0 }
  0xe9   : > { %v594_v29 = vadd.f32 %v4869_v52, %v5782_v20 }
  0xea   : > { %v585_v53 = vpop.f32.mrf.mxu0 }
  0xeb   : > { %v688_v41 = vmax.f32 %v594_v29, 0.0  ;;  %v586_v42 = vadd.f32 %v5782_v20, %v585_v53 }
  0xec   : > { %v4872_v54 = vpop.f32.mrf.mxu0 }
  0xed   : > { %v607_v10 = vadd.f32 %v4872_v54, %v5782_v20 }
  0xee   : > { %v598_v55 = vpop.f32.mrf.mxu0 }
  0xef   : > { %v691_v23 = vmax.f32 %v607_v10, 0.0  ;;  %v599_v24 = vadd.f32 %v5782_v20, %v598_v55  ;;  %v714_v55 = vpack.c.bf16 %v688_v41, %v687_v49 }
  0xf0   : > { %v4873_v56 = vpop.f32.mrf.mxu0 }
  0xf1   : > { %v610_v7 = vadd.f32 %v4873_v56, %v5782_v20  ;;  %v689_v38 = vmax.f32 %v599_v24, 0.0  ;;  %v686_v56 = vmax.f32 %v586_v42, 0.0 }
  0xf2   : > { %v601_v57 = vpop.f32.mrf.mxu0 }
  0xf3   : > { %v692_v14 = vmax.f32 %v610_v7, 0.0  ;;  %v602_v15 = vadd.f32 %v5782_v20, %v601_v57 }
  0xf4   : > { %v5805_v58 = vpop.f32.mrf.mxu0 }
  0xf5   : > { %v690_v30 = vmax.f32 %v602_v15, 0.0  ;;  %v716_v31 = vpack.c.bf16 %v692_v14, %v691_v23 }
  0xf6   : > { %v5807_v59 = vpop.f32.mrf.mxu0 }
  0xf7   : > { %v715_v43 = vpack.c.bf16 %v690_v30, %v689_v38 }
  0xf8   : > { %v5809_v60 = vpop.f32.mrf.mxu0 }
  0xfa   : > { %v5811_v61 = vpop.f32.mrf.mxu0 }
  0xfc   : > { %v4880_v62 = vpop.f32.mrf.mxu0 }
  0xfd   : > { %v639_v52 = vadd.f32 %v4880_v62, %v5782_v20  ;;  %v626_v62 = vadd.f32 %v5809_v60, %v5782_v20  ;;  %v615_v60 = vadd.f32 %v5782_v20, %v5807_v59  ;;  %v5666_v59 = vmov 0.0  }
  0xfe   : > { %v5813_v63 = vpop.f32.mrf.mxu0  ;;  %3836 = vst [vmem:[%s6364_s27 + $0xd] sm:$0x1] %v5666_v59  ;;  %3837 = vst [vmem:[%s6364_s27 + $0xe] sm:$0x1] %v5666_v59 }
  0xff   : > { %3838 = vst [vmem:[%s6364_s27 + $0xf] sm:$0x1] %v5666_v59 }
 0x100   : > { %v4881_v0 = vpop.f32.mrf.mxu0 }
 0x101   : > { %v642_v44 = vadd.f32 %v4881_v0, %v5782_v20  ;;  %v699_v0 = vmax.f32 %v639_v52, 0.0 }
 0x102   : > { %v633_v1 = vpop.f32.mrf.mxu0 }
 0x103   : > { %v700_v57 = vmax.f32 %v642_v44, 0.0 }
 0x104   : > { %v4884_v2 = vpop.f32.mrf.mxu0 }
 0x105   : > { %v655_v25 = vadd.f32 %v4884_v2, %v5782_v20  ;;  %v634_v2 = vadd.f32 %v5782_v20, %v633_v1  ;;  %v623_v1 = vadd.f32 %v5805_v58, %v5782_v20  ;;  %v693_v58 = vmax.f32 %v615_v60, 0.0 }
 0x106   : > { %v646_v3 = vpop.f32.mrf.mxu0 }
 0x107   : > { %v703_v39 = vmax.f32 %v655_v25, 0.0  ;;  %v647_v40 = vadd.f32 %v5782_v20, %v646_v3  ;;  %v685_v3 = vmax.f32 %v583_v46, 0.0 }
 0x108   : > { %v4885_v4 = vpop.f32.mrf.mxu0 }
 0x109   : > { %v658_v17 = vadd.f32 %v4885_v4, %v5782_v20  ;;  %v701_v54 = vmax.f32 %v647_v40, 0.0  ;;  %v631_v4 = vadd.f32 %v5782_v20, %v5813_v63  ;;  %v713_v50 = vpack.c.bf16 %v686_v56, %v685_v3 }
 0x10a   : > { %v649_v5 = vpop.f32.mrf.mxu0  ;;  %v695_v63 = vmax.f32 %v623_v1, 0.0 }
 0x10b   : > { %v704_v32 = vmax.f32 %v658_v17, 0.0  ;;  %v650_v33 = vadd.f32 %v5782_v20, %v649_v5  ;;  %v720_v5 = vpack.c.bf16 %v700_v57, %v699_v0  ;;  %v697_v7 = vmax.f32 %v631_v4, 0.0 }
 0x10c   : > { %v4888_v6 = vpop.f32.mrf.mxu0 }
 0x10d   : > { %v671_v9 = vadd.f32 %v4888_v6, %v5782_v20  ;;  %v722_v45 = vpack.c.bf16 %v704_v32, %v703_v39  ;;  %v702_v47 = vmax.f32 %v650_v33, 0.0  ;;  %v698_v6 = vmax.f32 %v634_v2, 0.0 }
 0x10e   : > { %v662_v8 = vpop.f32.mrf.mxu0 }
 0x10f   : > { %v663_v12 = vadd.f32 %v5782_v20, %v662_v8  ;;  %v707_v19 = vmax.f32 %v671_v9, 0.0  ;;  %v721_v53 = vpack.c.bf16 %v702_v47, %v701_v54  ;;  %v696_v8 = vmax.f32 %v626_v62, 0.0 }
 0x110   : > { %v4889_v11 = vpop.f32.mrf.mxu0  ;;  %v618_v9 = vadd.f32 %v5782_v20, %v5811_v61  ;;  %v719_v10 = vpack.c.bf16 %v698_v6, %v697_v7  ;;  %v730_v61 = vpop.permute.xlu0 %729 }
 0x111   : > { %v674_v13 = vadd.f32 %v4889_v11, %v5782_v20  ;;  %v705_v26 = vmax.f32 %v663_v12, 0.0  ;;  %v718_v11 = vpack.c.bf16 %v696_v8, %v695_v63 }
 0x112   : > { %v665_v16 = vpop.f32.mrf.mxu0  ;;  %v694_v12 = vmax.f32 %v618_v9, 0.0 }
 0x113   : > { %v708_v21 = vmax.f32 %v674_v13, 0.0  ;;  %v666_v22 = vadd.f32 %v5782_v20, %v665_v16  ;;  %v5441_v20 = vld [vmem:[%s6922_s5 + $0x38] sm:$0xff]  }
 0x114   : > { %v717_v13 = vpack.c.bf16 %v694_v12, %v693_v58 }
 0x115   : > { %v706_v27 = vmax.f32 %v666_v22, 0.0  ;;  %v724_v28 = vpack.c.bf16 %v708_v21, %v707_v19 }
 0x117   : > { %v723_v35 = vpack.c.bf16 %v706_v27, %v705_v26  ;;  %4580 = vmatprep.subr.bf16.mxu1 %v724_v28  ;;  %4598 = vmatprep.subr.bf16.mxu0 %v724_v28 }
 0x118   : > { %4581 = vmatpush3.bf16.xpose.msra.mxu1 %v716_v31  ;;  %4599 = vmatpush3.bf16.msra.mxu0 %v716_v31 }
 0x119   : > { %4582 = vmatprep.subr.bf16.mxu1 %v723_v35  ;;  %4600 = vmatprep.subr.bf16.mxu0 %v723_v35 }
 0x11c   : > { %4601 = vmatpush3.bf16.msra.mxu0 %v715_v43 }
 0x11d   : > { %4602 = vmatprep.subr.bf16.mxu0 %v722_v45 }
 0x120   : > { %4583 = vmatpush3.bf16.xpose.msra.mxu1 %v715_v43  ;;  %4603 = vmatpush3.bf16.msra.mxu0 %v714_v55 }
 0x121   : > { %4584 = vmatprep.subr.bf16.mxu1 %v722_v45  ;;  %4604 = vmatprep.subr.bf16.mxu0 %v721_v53 }
 0x124   : > { %4605 = vmatpush3.bf16.msra.mxu0 %v713_v50 }
 0x125   : > { %4606 = vmatprep.subr.bf16.mxu0 %v720_v5 }
 0x128   : > { %4585 = vmatpush3.bf16.xpose.msra.mxu1 %v714_v55  ;;  %4607 = vmatpush3.bf16.msra.mxu0 %v5799_v48 }
 0x129   : > { %4586 = vmatprep.subr.bf16.mxu1 %v721_v53  ;;  %4608 = vmatprep.subr.bf16.mxu0 %v719_v10 }
 0x12c   : > { %4609 = vmatpush3.bf16.msra.mxu0 %v5803_v51 }
 0x12d   : > { %4610 = vmatprep.subr.bf16.mxu0 %v718_v11 }
 0x130   : > { %4587 = vmatpush3.bf16.xpose.msra.mxu1 %v713_v50  ;;  %4611 = vmatpush3.bf16.msra.mxu0 %v5791_v34 }
 0x131   : > { %4588 = vmatprep.subr.bf16.mxu1 %v720_v5  ;;  %4612 = vmatprep.subr.bf16.mxu0 %v717_v13 }
 0x134   : > { %4613 = vmatpush3.bf16.msra.mxu0 %v5793_v37 }
 0x135   : > { %4910 = vmatprep.subr.bf16.mxu0 %v5666_v59 }
 0x138   : > { %4589 = vmatpush3.bf16.xpose.msra.mxu1 %v5799_v48  ;;  %v5442_v48 = vld [vmem:[%s6922_s5 + $0x30] sm:$0xff]  }
 0x139   : > { %4590 = vmatprep.subr.bf16.mxu1 %v719_v10 }
 0x140   : > { %4591 = vmatpush3.bf16.xpose.msra.mxu1 %v5803_v51  ;;  %v5446_v51 = vld [vmem:[%s6922_s5 + $0x10] sm:$0xff]  }
 0x141   : > { %4592 = vmatprep.subr.bf16.mxu1 %v718_v11 }
 0x148   : > { %4593 = vmatpush3.bf16.xpose.msra.mxu1 %v5791_v34  ;;  %v5444_v34 = vld [vmem:[%s6922_s5 + $0x20] sm:$0xff]  }
 0x149   : > { %4594 = vmatprep.subr.bf16.mxu1 %v717_v13 }
 0x150   : > { %4595 = vmatpush3.bf16.xpose.msra.mxu1 %v5793_v37  ;;  %v5445_v37 = vld [vmem:[%s6922_s5 + $0x18] sm:$0xff]  }
 0x151   : > { %4890 = vmatprep.subr.bf16.mxu1 %v5666_v59 }
 0x157   : > { %4597 = vmatmul.mubr.bf16.vlgmr.msra.gmra.mxu1 %v5776_v18  ;;  %v5443_v18 = vld [vmem:[%s6922_s5 + $0x28] sm:$0xff]  }
 0x158   : > { %4891 = vmatpush3.bf16.msra.mxu1 %v5441_v20  ;;  %4906 = vmatprep.mubr.msk.bf16.mxu1 %vm5668_vm10, %v5666_v59 }
 0x159   : > { %4892 = vmatprep.subr.bf16.mxu1 %v5666_v59 }
 0x15c   : > { %4893 = vmatpush3.bf16.msra.mxu1 %v5442_v48 }
 0x15d   : > { %4894 = vmatprep.subr.bf16.mxu1 %v5666_v59 }
 0x160   : > { %4895 = vmatpush3.bf16.msra.mxu1 %v5443_v18 }
 0x161   : > { %4896 = vmatprep.subr.bf16.mxu1 %v5666_v59 }
 0x164   : > { %4897 = vmatpush3.bf16.msra.mxu1 %v5444_v34 }
 0x165   : > { %4898 = vmatprep.subr.bf16.mxu1 %v5666_v59 }
 0x168   : > { %4899 = vmatpush3.bf16.msra.mxu1 %v5445_v37 }
 0x169   : > { %4900 = vmatprep.subr.bf16.mxu1 %v5666_v59 }
 0x16c   : > { %4901 = vmatpush3.bf16.msra.mxu1 %v5446_v51 }
 0x16d   : > { %4902 = vmatprep.subr.bf16.mxu1 %v5666_v59 }
 0x217   : > { %v766_v14 = vpop.f32.mrf.mxu1 }
 0x218   : > { %v767_v15 = vadd.f32 %v766_v14, %v730_v61 }
 0x219   : > { %v768_v16 = vpop.f32.mrf.mxu1 }
 0x21a   : > { %v3935_v17 = vmul.f32 -1.442695, %v767_v15  ;;  %v769_v19 = vadd.f32 %v768_v16, %v730_v61 }
 0x21b   : > { %v770_v21 = vpop.f32.mrf.mxu1 }
 0x21c   : > { %5649 = vpow2.f32 %v3935_v17  ;;  %v3936_v22 = vmul.f32 -1.442695, %v769_v19 }
 0x21d   : > { %v771_v23 = vpop.f32.mrf.mxu1 }
 0x21e   : > { %5651 = vpow2.f32 %v3936_v22 }
 0x229   : > { %v5650_v24 = vpop.eup %5649 }
 0x22a   : > { %v779_v25 = vadd.f32 1.0, %v5650_v24 }
 0x22b   : > { %v5652_v26 = vpop.eup %5651 }
 0x22c   : > { %5653 = vrcp.f32 %v779_v25  ;;  %v780_v27 = vadd.f32 1.0, %v5652_v26 }
 0x22e   : > { %5655 = vrcp.f32 %v780_v27 }
 0x239   : > { %v5654_v28 = vpop.eup %5653 }
 0x23a   : > { %v785_v29 = vsub.f32 1.0, %v5654_v28 }
 0x23b   : > { %v5880_v30 = vpop.eup %5655 }
 0x23c   : > { %v786_v31 = vsub.f32 1.0, %v5880_v30  ;;  %v789_v32 = vrot.slane %v785_v29, 7  ;;  %v795_v33 = vrot.slane %v785_v29, 1  ;;  %v809_v35 = vrot.slane %v785_v29, 2 }
 0x23d   : > { %v823_v36 = vrot.slane %v785_v29, 3  ;;  %v837_v38 = vrot.slane %v785_v29, 4  ;;  %v851_v39 = vrot.slane %v785_v29, 5 }
 0x23e   : > { %v790_v40 = vrot.slane %v786_v31, 7  ;;  %v5883_v41 = vmul.f32 %v5654_v28, %v789_v32  ;;  %v796_v42 = vrot.slane %v786_v31, 1  ;;  %v5885_v43 = vmul.f32 %v795_v33, %v785_v29 }
 0x23f   : > { %v810_v44 = vrot.slane %v786_v31, 2  ;;  %v824_v45 = vrot.slane %v786_v31, 3  ;;  %v838_v47 = vrot.slane %v786_v31, 4  ;;  %v852_v49 = vrot.slane %v786_v31, 5 }
 0x240   : > { %v794_v46 = vmul.f32 %v5880_v30, %v790_v40  ;;  %v800_v52 = vmul.f32 %v796_v42, %v786_v31  ;;  %v803_v54 = vrot.slane %v5885_v43, 6  ;;  %v5890_v55 = vmul.f32 %v809_v35, %v5885_v43 }
 0x241   : > { %v859_v56 = vrot.slane %v5883_v41, 7  ;;  %v863_v57 = vrot.slane %v5885_v43, 5  ;;  %v914_v2 = vsel %vm913_vm1, %v5654_v28, %v789_v32  ;;  %v915_v53 = vsel %vm913_vm1, %v5880_v30, %v790_v40 }
 0x242   : > { %v804_v3 = vrot.slane %v800_v52, 6  ;;  %v807_v0 = vmul.f32 %v5654_v28, %v803_v54  ;;  %v814_v4 = vmul.f32 %v810_v44, %v800_v52  ;;  %v817_v50 = vrot.slane %v5890_v55, 5 }
 0x243   : > { %v5899_v62 = vmul.f32 %v823_v36, %v5890_v55  ;;  %v860_v5 = vrot.slane %v794_v46, 7  ;;  %v864_v6 = vrot.slane %v800_v52, 5  ;;  %v873_v1 = vrot.slane %v5890_v55, 3 }
 0x244   : > { %v808_v7 = vmul.f32 %v5880_v30, %v804_v3  ;;  %v818_v8 = vrot.slane %v814_v4, 5  ;;  %v821_v9 = vmul.f32 %v5654_v28, %v817_v50  ;;  %v828_v10 = vmul.f32 %v824_v45, %v814_v4 }
 0x245   : > { %v831_v63 = vrot.slane %v5899_v62, 4  ;;  %v841_v60 = vmul.f32 %v837_v38, %v5899_v62  ;;  %v869_v11 = vrot.slane %v807_v0, 6  ;;  %v874_v12 = vrot.slane %v814_v4, 3  ;;  %v5447_v0 = vld [vmem:[%s6922_s5 + $0x8] sm:$0xff]   ;;  %v5448_v4 = vld [vmem:[%s6922_s5] sm:$0xff]  }
 0x246   : > { %v822_v58 = vmul.f32 %v5880_v30, %v818_v8  ;;  %v832_v13 = vrot.slane %v828_v10, 4  ;;  %v842_v20 = vmul.f32 %v838_v47, %v828_v10  ;;  %v870_v48 = vrot.slane %v808_v7, 6  ;;  %4903 = vmatpush3.bf16.msra.mxu1 %v5447_v0  ;;  %v5450_v8 = vld [vmem:[%s6922_s5 + $0x70] sm:$0xff]   ;;  %v5494_v0 = vld [vmem:[%s6922_s5 + $0x1a0] sm:$0xff]  }
 0x247   : > { %v835_v18 = vmul.f32 %v5654_v28, %v831_v63  ;;  %v845_v34 = vrot.slane %v841_v60, 3  ;;  %v855_v37 = vmul.f32 %v851_v39, %v841_v60  ;;  %v879_v51 = vrot.slane %v821_v9, 5  ;;  %4904 = vmatprep.subr.bf16.mxu1 %v5666_v59  ;;  %v5451_v9 = vld [vmem:[%s6922_s5 + $0x68] sm:$0xff]   ;;  %v5453_v63 = vld [vmem:[%s6922_s5 + $0x58] sm:$0xff]  }
 0x248   : > { %v836_v61 = vmul.f32 %v5880_v30, %v832_v13  ;;  %v846_v14 = vrot.slane %v842_v20, 3  ;;  %v856_v15 = vmul.f32 %v852_v49, %v842_v20  ;;  %v880_v16 = vrot.slane %v822_v58, 5  ;;  %v5457_v58 = vld [vmem:[%s6922_s5 + $0xb8] sm:$0xff]  }
 0x249   : > { %v849_v17 = vmul.f32 %v5654_v28, %v845_v34  ;;  %v883_v19 = vrot.slane %v5899_v62, 1  ;;  %v884_v21 = vrot.slane %v828_v10, 1  ;;  %v889_v22 = vrot.slane %v835_v18, 4  ;;  %v5452_v10 = vld [vmem:[%s6922_s5 + $0x60] sm:$0xff]   ;;  %v5491_v18 = vld [vmem:[%s6924_s7 + $0x38] sm:$0xff]  }
 0x24a   : > { %v850_v23 = vmul.f32 %v5880_v30, %v846_v14  ;;  %v890_v24 = vrot.slane %v836_v61, 4  ;;  %v893_v25 = vrot.slane %v841_v60, 7  ;;  %v894_v26 = vrot.slane %v842_v20, 7  ;;  %4905 = vmatpush3.bf16.msra.mxu1 %v5448_v4  ;;  %v5454_v60 = vld [vmem:[%s6922_s5 + $0x50] sm:$0xff]   ;;  %v5460_v34 = vld [vmem:[%s6922_s5 + $0xa0] sm:$0xff]   ;;  %v5495_v61 = vld [vmem:[%s6924_s7 + $0x28] sm:$0xff]  }
 0x24b   : > { %v899_v27 = vrot.slane %v849_v17, 3  ;;  %v905_v29 = vrot.slane %v855_v37, 5  ;;  %v906_v31 = vrot.slane %v856_v15, 5  ;;  %v909_v32 = vrot.slane %v855_v37, 4  ;;  %4930 = vmatprep.subr.bf16.mxu1 %v5666_v59  ;;  %v5458_v20 = vld [vmem:[%s6922_s5 + $0xb0] sm:$0xff]   ;;  %v5499_v17 = vld [vmem:[%s6924_s7 + $0x18] sm:$0xff]  }
 0x24c   : > { %v900_v33 = vrot.slane %v850_v23, 3  ;;  %v910_v35 = vrot.slane %v856_v15, 4  ;;  %v917_v36 = vsel %vm916_vm2, %v914_v2, %v859_v56  ;;  %v918_v38 = vsel %vm916_vm2, %v915_v53, %v860_v5  ;;  %v5493_v37 = vld [vmem:[%s6924_s7 + $0x30] sm:$0xff]   ;;  %v5497_v15 = vld [vmem:[%s6924_s7 + $0x20] sm:$0xff]   ;;  %v5503_v23 = vld [vmem:[%s6924_s7 + $0x8] sm:$0xff]  }
 0x24d   : > { %v920_v28 = vsel %vm919_vm3, %v917_v36, %v863_v57  ;;  %v921_v39 = vsel %vm919_vm3, %v918_v38, %v864_v6  ;;  %v934_v40 = vsel %vm913_vm1, %v889_v22, %v893_v25  ;;  %v935_v30 = vsel %vm913_vm1, %v890_v24, %v894_v26  ;;  %v5462_v14 = vld [vmem:[%s6922_s5 + $0x90] sm:$0xff]   ;;  %v5465_v22 = vld [vmem:[%s6922_s5 + $0xf8] sm:$0xff]   ;;  %v5467_v26 = vld [vmem:[%s6922_s5 + $0xe8] sm:$0xff]  }
 0x24e   : > { %v923_v41 = vsel %vm922_vm4, %v920_v28, %v869_v11  ;;  %v924_v42 = vsel %vm922_vm4, %v921_v39, %v870_v48  ;;  %v936_v43 = vsel %vm916_vm2, %v934_v40, %v899_v27  ;;  %v937_v44 = vsel %vm916_vm2, %v935_v30, %v900_v33  ;;  %v5455_v11 = vld [vmem:[%s6922_s5 + $0x48] sm:$0xff]   ;;  %v5466_v25 = vld [vmem:[%s6922_s5 + $0xf0] sm:$0xff]   ;;  %v5505_v27 = vld [vmem:[%s6924_s7] sm:$0xff]  }
 0x24f   : > { %v926_v45 = vsel %vm925_vm5, %v923_v41, %v873_v1  ;;  %v927_v47 = vsel %vm925_vm5, %v924_v42, %v874_v12  ;;  %v938_v49 = vsel %vm919_vm3, %v936_v43, %v905_v29  ;;  %v939_v46 = vsel %vm919_vm3, %v937_v44, %v906_v31  ;;  %v5449_v1 = vld [vmem:[%s6922_s5 + $0x78] sm:$0xff]   ;;  %v5456_v12 = vld [vmem:[%s6922_s5 + $0x40] sm:$0xff]   ;;  %v5459_v48 = vld [vmem:[%s6922_s5 + $0xa8] sm:$0xff]  }
 0x250   : > { %v929_v52 = vsel %vm928_vm6, %v926_v45, %v879_v51  ;;  %v930_v54 = vsel %vm928_vm6, %v927_v47, %v880_v16  ;;  %v940_v55 = vsel %vm922_vm4, %v938_v49, %v909_v32  ;;  %v941_v56 = vsel %vm922_vm4, %v939_v46, %v910_v35  ;;  %v5461_v51 = vld [vmem:[%s6922_s5 + $0x98] sm:$0xff]   ;;  %v5463_v16 = vld [vmem:[%s6922_s5 + $0x88] sm:$0xff]   ;;  %v5468_v29 = vld [vmem:[%s6922_s5 + $0xe0] sm:$0xff]  }
 0x251   : > { %v933_v57 = vsel %vm931_vm7, %v930_v54, %v884_v21  ;;  %v932_v2 = vsel %vm931_vm7, %v929_v52, %v883_v19  ;;  %v5464_v19 = vld [vmem:[%s6922_s5 + $0x80] sm:$0xff]   ;;  %v5501_v21 = vld [vmem:[%s6924_s7 + $0x10] sm:$0xff]   ;;  %v5469_v31 = vld [vmem:[%s6922_s5 + $0xd8] sm:$0xff]  }
 0x252   : > { %v3938_v53 = vpack.c.bf16 %v941_v56, %v933_v57  ;;  %v3941_v3 = vpack.c.bf16 %v940_v55, %v932_v2  ;;  %v5470_v32 = vld [vmem:[%s6922_s5 + $0xd0] sm:$0xff]   ;;  %v5471_v33 = vld [vmem:[%s6922_s5 + $0xc8] sm:$0xff]   ;;  %v5472_v35 = vld [vmem:[%s6922_s5 + $0xc0] sm:$0xff]  }
 0x253   : > { %v5473_v36 = vld [vmem:[%s6922_s5 + $0x138] sm:$0xff]   ;;  %v5474_v28 = vld [vmem:[%s6922_s5 + $0x130] sm:$0xff]   ;;  %v5475_v39 = vld [vmem:[%s6922_s5 + $0x128] sm:$0xff]  }
 0x254   : > { %3939 = vmatprep.mubr.msk.bf16.mxu0 %vm3937_vm9, %v3938_v53  ;;  %v5476_v40 = vld [vmem:[%s6922_s5 + $0x120] sm:$0xff]   ;;  %v5477_v30 = vld [vmem:[%s6922_s5 + $0x118] sm:$0xff]   ;;  %v5478_v41 = vld [vmem:[%s6922_s5 + $0x110] sm:$0xff]  }
 0x255   : > { %3942 = vmatmul.mubr.msk.bf16.vlgmr.msra.gmra.mxu0 %vm3937_vm9, %v3941_v3  ;;  %v5479_v42 = vld [vmem:[%s6922_s5 + $0x108] sm:$0xff]   ;;  %v5480_v43 = vld [vmem:[%s6922_s5 + $0x100] sm:$0xff]   ;;  %v5481_v44 = vld [vmem:[%s6922_s5 + $0x178] sm:$0xff]  }
 0x256   : > { %4926 = vmatprep.mubr.msk.bf16.mxu0 %vm5668_vm10, %v5666_v59  ;;  %4911 = vmatpush3.bf16.msra.mxu0 %v5491_v18  ;;  %v5482_v47 = vld [vmem:[%s6922_s5 + $0x170] sm:$0xff]   ;;  %v5483_v49 = vld [vmem:[%s6922_s5 + $0x168] sm:$0xff]   ;;  %v5484_v46 = vld [vmem:[%s6922_s5 + $0x160] sm:$0xff]  }
 0x257   : > { %4912 = vmatprep.subr.bf16.mxu0 %v5666_v59  ;;  %v5485_v52 = vld [vmem:[%s6922_s5 + $0x158] sm:$0xff]   ;;  %v5486_v54 = vld [vmem:[%s6922_s5 + $0x150] sm:$0xff]   ;;  %v5487_v55 = vld [vmem:[%s6922_s5 + $0x148] sm:$0xff]  }
 0x258   : > { %v5488_v56 = vld [vmem:[%s6922_s5 + $0x140] sm:$0xff]   ;;  %v5489_v57 = vld [vmem:[%s6922_s5 + $0x1b8] sm:$0xff]   ;;  %v5490_v53 = vld [vmem:[%s6922_s5 + $0x1b0] sm:$0xff]  }
 0x259   : > { %v5492_v3 = vld [vmem:[%s6922_s5 + $0x1a8] sm:$0xff]   ;;  %v5496_v4 = vld [vmem:[%s6922_s5 + $0x198] sm:$0xff]   ;;  %v5509_v18 = vld [vmem:[%s6924_s7 + $0x70] sm:$0xff]  }
 0x25a   : > { %4913 = vmatpush3.bf16.msra.mxu0 %v5493_v37  ;;  %v5511_v37 = vld [vmem:[%s6924_s7 + $0x68] sm:$0xff]  }
 0x25b   : > { %4914 = vmatprep.subr.bf16.mxu0 %v5666_v59 }
 0x25e   : > { %4915 = vmatpush3.bf16.msra.mxu0 %v5495_v61  ;;  %v5513_v61 = vld [vmem:[%s6924_s7 + $0x60] sm:$0xff]  }
 0x25f   : > { %4916 = vmatprep.subr.bf16.mxu0 %v5666_v59 }
 0x262   : > { %4917 = vmatpush3.bf16.msra.mxu0 %v5497_v15  ;;  %v5515_v15 = vld [vmem:[%s6924_s7 + $0x58] sm:$0xff]  }
 0x263   : > { %4918 = vmatprep.subr.bf16.mxu0 %v5666_v59 }
 0x266   : > { %4919 = vmatpush3.bf16.msra.mxu0 %v5499_v17  ;;  %v5517_v17 = vld [vmem:[%s6924_s7 + $0x50] sm:$0xff]  }
 0x267   : > { %4920 = vmatprep.subr.bf16.mxu0 %v5666_v59 }
 0x26a   : > { %4921 = vmatpush3.bf16.msra.mxu0 %v5501_v21  ;;  %v5519_v21 = vld [vmem:[%s6924_s7 + $0x48] sm:$0xff]  }
 0x26b   : > { %4922 = vmatprep.subr.bf16.mxu0 %v5666_v59 }
 0x26e   : > { %4923 = vmatpush3.bf16.msra.mxu0 %v5503_v23  ;;  %v3975_v23 = vld [vmem:[%s6923_s6 + $0x1] sm:$0x1] }
 0x26f   : > { %4924 = vmatprep.subr.bf16.mxu0 %v5666_v59 }
 0x272   : > { %4925 = vmatpush3.bf16.msra.mxu0 %v5505_v27 }
 0x273   : > { %4950 = vmatprep.subr.bf16.mxu0 %v5666_v59 }
 0x315   : > { %v4614_v50 = vpop.f32.mrf.mxu0 }
 0x317   : > { %v4615_v62 = vpop.f32.mrf.mxu0 }
 0x318   : > { %v4616_v5 = vadd.f32 %v4615_v62, %v4614_v50  ;;  %v5498_v50 = vld [vmem:[%s6922_s5 + $0x190] sm:$0xff]   ;;  %v5500_v62 = vld [vmem:[%s6922_s5 + $0x188] sm:$0xff]  }
 0x31a   : > { %v987_v6 = vmul.f32 0.00390625, %v4616_v5  ;;  %v5502_v5 = vld [vmem:[%s6922_s5 + $0x180] sm:$0xff]  }
 0x31c   : > { %v5945_v7 = vpack.c.bf16 %v987_v6, %v987_v6  ;;  %v5504_v6 = vld [vmem:[%s6922_s5 + $0x1f8] sm:$0xff]  }
 0x31e   : > { %4907 = vmatmul.mubr.bf16.vlgmr.msra.gmra.mxu1 %v5945_v7  ;;  %v5982_v13 = vshrl.u32 %v5945_v7, 16  ;;  %v1442_v24 = vrot.slane %v5945_v7, 1  ;;  %v1878_v45 = vrot.slane %v5945_v7, 2 }
 0x31f   : > { %4931 = vmatpush3.bf16.msra.mxu1 %v5449_v1  ;;  %4946 = vmatprep.mubr.msk.bf16.mxu1 %vm5668_vm10, %v5666_v59  ;;  %v2314_v1 = vrot.slane %v5945_v7, 3 }
 0x320   : > { %4932 = vmatprep.subr.bf16.mxu1 %v5666_v59  ;;  %v1660_v38 = vrot.slane %v5982_v13, 1  ;;  %v2096_v2 = vrot.slane %v5982_v13, 2 }
 0x323   : > { %4933 = vmatpush3.bf16.msra.mxu1 %v5450_v8  ;;  %v1006_v8 = vld [vmem:[%s6923_s6] sm:$0x1] }
 0x324   : > { %4934 = vmatprep.subr.bf16.mxu1 %v5666_v59 }
 0x327   : > { %4935 = vmatpush3.bf16.msra.mxu1 %v5451_v9 }
 0x328   : > { %4936 = vmatprep.subr.bf16.mxu1 %v5666_v59 }
 0x32b   : > { %4937 = vmatpush3.bf16.msra.mxu1 %v5452_v10 }
 0x32c   : > { %4938 = vmatprep.subr.bf16.mxu1 %v5666_v59 }
 0x32f   : > { %4939 = vmatpush3.bf16.msra.mxu1 %v5453_v63  ;;  %v5506_v63 = vld [vmem:[%s6922_s5 + $0x1f0] sm:$0xff]  }
 0x330   : > { %4940 = vmatprep.subr.bf16.mxu1 %v5666_v59 }
 0x333   : > { %4941 = vmatpush3.bf16.msra.mxu1 %v5454_v60 }
 0x334   : > { %4942 = vmatprep.subr.bf16.mxu1 %v5666_v59 }
 0x337   : > { %4943 = vmatpush3.bf16.msra.mxu1 %v5455_v11 }
 0x338   : > { %4944 = vmatprep.subr.bf16.mxu1 %v5666_v59 }
 0x33b   : > { %4945 = vmatpush3.bf16.msra.mxu1 %v5456_v12  ;;  %v5507_v12 = vld [vmem:[%s6924_s7 + $0x78] sm:$0xff]  }
 0x33c   : > { %4970 = vmatprep.subr.bf16.mxu1 %v5666_v59 }
 0x33e   : > { %4947 = vmatmul.mubr.bf16.vlgmr.msra.gmra.mxu1 %v5982_v13 }
 0x33f   : > { %4971 = vmatpush3.bf16.msra.mxu1 %v5457_v58  ;;  %4986 = vmatprep.mubr.msk.bf16.mxu1 %vm5668_vm10, %v5666_v59 }
 0x340   : > { %4972 = vmatprep.subr.bf16.mxu1 %v5666_v59 }
 0x343   : > { %4973 = vmatpush3.bf16.msra.mxu1 %v5458_v20  ;;  %v5508_v20 = vld [vmem:[%s6922_s5 + $0x1e8] sm:$0xff]  }
 0x344   : > { %4974 = vmatprep.subr.bf16.mxu1 %v5666_v59 }
 0x347   : > { %4975 = vmatpush3.bf16.msra.mxu1 %v5459_v48 }
 0x348   : > { %4976 = vmatprep.subr.bf16.mxu1 %v5666_v59 }
 0x34b   : > { %4977 = vmatpush3.bf16.msra.mxu1 %v5460_v34  ;;  %v5510_v34 = vld [vmem:[%s6922_s5 + $0x1e0] sm:$0xff]  }
 0x34c   : > { %4978 = vmatprep.subr.bf16.mxu1 %v5666_v59 }
 0x34f   : > { %4979 = vmatpush3.bf16.msra.mxu1 %v5461_v51  ;;  %v5512_v51 = vld [vmem:[%s6922_s5 + $0x1d8] sm:$0xff]  }
 0x350   : > { %4980 = vmatprep.subr.bf16.mxu1 %v5666_v59 }
 0x353   : > { %4981 = vmatpush3.bf16.msra.mxu1 %v5462_v14  ;;  %v5514_v14 = vld [vmem:[%s6922_s5 + $0x1d0] sm:$0xff]  }
 0x354   : > { %4982 = vmatprep.subr.bf16.mxu1 %v5666_v59 }
 0x357   : > { %4983 = vmatpush3.bf16.msra.mxu1 %v5463_v16  ;;  %v5516_v16 = vld [vmem:[%s6922_s5 + $0x1c8] sm:$0xff]  }
 0x358   : > { %4984 = vmatprep.subr.bf16.mxu1 %v5666_v59 }
 0x35b   : > { %4985 = vmatpush3.bf16.msra.mxu1 %v5464_v19  ;;  %v5518_v19 = vld [vmem:[%s6922_s5 + $0x1c0] sm:$0xff]  }
 0x35c   : > { %5010 = vmatprep.subr.bf16.mxu1 %v5666_v59 }
 0x35e   : > { %4987 = vmatmul.mubr.bf16.vlgmr.msra.gmra.mxu1 %v1442_v24  ;;  %v2532_v24 = vrot.slane %v5982_v13, 3 }
 0x35f   : > { %5011 = vmatpush3.bf16.msra.mxu1 %v5465_v22  ;;  %5026 = vmatprep.mubr.msk.bf16.mxu1 %vm5668_vm10, %v5666_v59  ;;  %v5520_v22 = vld [vmem:[%s6922_s5 + $0x238] sm:$0xff]  }
 0x360   : > { %5012 = vmatprep.subr.bf16.mxu1 %v5666_v59 }
 0x363   : > { %5013 = vmatpush3.bf16.msra.mxu1 %v5466_v25 }
 0x364   : > { %5014 = vmatprep.subr.bf16.mxu1 %v5666_v59 }
 0x367   : > { %5015 = vmatpush3.bf16.msra.mxu1 %v5467_v26  ;;  %v5521_v26 = vld [vmem:[%s6924_s7 + $0x40] sm:$0xff]  }
 0x368   : > { %5016 = vmatprep.subr.bf16.mxu1 %v5666_v59 }
 0x36b   : > { %5017 = vmatpush3.bf16.msra.mxu1 %v5468_v29  ;;  %v5522_v29 = vld [vmem:[%s6922_s5 + $0x230] sm:$0xff]  }
 0x36c   : > { %5018 = vmatprep.subr.bf16.mxu1 %v5666_v59 }
 0x36f   : > { %5019 = vmatpush3.bf16.msra.mxu1 %v5469_v31 }
 0x370   : > { %5020 = vmatprep.subr.bf16.mxu1 %v5666_v59 }
 0x373   : > { %5021 = vmatpush3.bf16.msra.mxu1 %v5470_v32 }
 0x374   : > { %5022 = vmatprep.subr.bf16.mxu1 %v5666_v59 }
 0x377   : > { %5023 = vmatpush3.bf16.msra.mxu1 %v5471_v33  ;;  %v5523_v33 = vld [vmem:[%s6924_s7 + $0xb8] sm:$0xff]  }
 0x378   : > { %5024 = vmatprep.subr.bf16.mxu1 %v5666_v59 }
 0x37b   : > { %5025 = vmatpush3.bf16.msra.mxu1 %v5472_v35 }
 0x37c   : > { %5050 = vmatprep.subr.bf16.mxu1 %v5666_v59 }
 0x37e   : > { %5027 = vmatmul.mubr.bf16.vlgmr.msra.gmra.mxu1 %v1660_v38 }
 0x37f   : > { %5051 = vmatpush3.bf16.msra.mxu1 %v5473_v36  ;;  %5066 = vmatprep.mubr.msk.bf16.mxu1 %vm5668_vm10, %v5666_v59  ;;  %v5524_v36 = vld [vmem:[%s6922_s5 + $0x228] sm:$0xff]  }
 0x380   : > { %5052 = vmatprep.subr.bf16.mxu1 %v5666_v59 }
 0x383   : > { %5053 = vmatpush3.bf16.msra.mxu1 %v5474_v28  ;;  %v5525_v28 = vld [vmem:[%s6924_s7 + $0xb0] sm:$0xff]  }
 0x384   : > { %5054 = vmatprep.subr.bf16.mxu1 %v5666_v59 }
 0x387   : > { %5055 = vmatpush3.bf16.msra.mxu1 %v5475_v39  ;;  %v5526_v39 = vld [vmem:[%s6922_s5 + $0x220] sm:$0xff]  }
 0x388   : > { %5056 = vmatprep.subr.bf16.mxu1 %v5666_v59 }
 0x38b   : > { %5057 = vmatpush3.bf16.msra.mxu1 %v5476_v40  ;;  %v5527_v40 = vld [vmem:[%s6924_s7 + $0xa8] sm:$0xff]  }
 0x38c   : > { %5058 = vmatprep.subr.bf16.mxu1 %v5666_v59 }
 0x38f   : > { %5059 = vmatpush3.bf16.msra.mxu1 %v5477_v30  ;;  %v5528_v30 = vld [vmem:[%s6922_s5 + $0x218] sm:$0xff]  }
 0x390   : > { %5060 = vmatprep.subr.bf16.mxu1 %v5666_v59 }
 0x393   : > { %5061 = vmatpush3.bf16.msra.mxu1 %v5478_v41  ;;  %v4617_v41 = vpop.f32.mrf.mxu0 }
 0x394   : > { %5062 = vmatprep.subr.bf16.mxu1 %v5666_v59 }
 0x397   : > { %5063 = vmatpush3.bf16.msra.mxu1 %v5479_v42  ;;  %v5529_v42 = vld [vmem:[%s6924_s7 + $0xa0] sm:$0xff]  }
 0x398   : > { %5064 = vmatprep.subr.bf16.mxu1 %v5666_v59 }
 0x39b   : > { %5065 = vmatpush3.bf16.msra.mxu1 %v5480_v43  ;;  %v5530_v43 = vld [vmem:[%s6922_s5 + $0x210] sm:$0xff]  }
 0x39c   : > { %5090 = vmatprep.subr.bf16.mxu1 %v5666_v59 }
 0x39e   : > { %5067 = vmatmul.mubr.bf16.vlgmr.msra.gmra.mxu1 %v1878_v45  ;;  %v5531_v45 = vld [vmem:[%s6924_s7 + $0x98] sm:$0xff]  }
 0x39f   : > { %5091 = vmatpush3.bf16.msra.mxu1 %v5481_v44  ;;  %5106 = vmatprep.mubr.msk.bf16.mxu1 %vm5668_vm10, %v5666_v59  ;;  %v4618_v44 = vpop.f32.mrf.mxu0 }
 0x3a0   : > { %5092 = vmatprep.subr.bf16.mxu1 %v5666_v59 }
 0x3a3   : > { %5093 = vmatpush3.bf16.msra.mxu1 %v5482_v47  ;;  %v5532_v47 = vld [vmem:[%s6922_s5 + $0x208] sm:$0xff]  }
 0x3a4   : > { %5094 = vmatprep.subr.bf16.mxu1 %v5666_v59 }
 0x3a7   : > { %5095 = vmatpush3.bf16.msra.mxu1 %v5483_v49  ;;  %v4619_v49 = vadd.f32 %v4618_v44, %v4617_v41 }
 0x3a8   : > { %5096 = vmatprep.subr.bf16.mxu1 %v5666_v59 }
 0x3ab   : > { %5097 = vmatpush3.bf16.msra.mxu1 %v5484_v46  ;;  %v5533_v46 = vld [vmem:[%s6924_s7 + $0x90] sm:$0xff]  }
 0x3ac   : > { %5098 = vmatprep.subr.bf16.mxu1 %v5666_v59 }
 0x3af   : > { %5099 = vmatpush3.bf16.msra.mxu1 %v5485_v52  ;;  %v5534_v52 = vld [vmem:[%s6922_s5 + $0x200] sm:$0xff]  }
 0x3b0   : > { %5100 = vmatprep.subr.bf16.mxu1 %v5666_v59 }
 0x3b3   : > { %5101 = vmatpush3.bf16.msra.mxu1 %v5486_v54  ;;  %v988_v54 = vmul.f32 0.00390625, %v4619_v49 }
 0x3b4   : > { %5102 = vmatprep.subr.bf16.mxu1 %v5666_v59 }
 0x3b7   : > { %5103 = vmatpush3.bf16.msra.mxu1 %v5487_v55  ;;  %v5535_v55 = vld [vmem:[%s6924_s7 + $0x88] sm:$0xff]  }
 0x3b8   : > { %5104 = vmatprep.subr.bf16.mxu1 %v5666_v59 }
 0x3bb   : > { %5105 = vmatpush3.bf16.msra.mxu1 %v5488_v56  ;;  %v5536_v56 = vld [vmem:[%s6922_s5 + $0x278] sm:$0xff]  }
 0x3bc   : > { %5130 = vmatprep.subr.bf16.mxu1 %v5666_v59 }
 0x3be   : > { %5107 = vmatmul.mubr.bf16.vlgmr.msra.gmra.mxu1 %v2096_v2  ;;  %v4025_v2 = vld [vmem:[%s6923_s6 + $0x2] sm:$0x1] }
 0x3bf   : > { %5131 = vmatpush3.bf16.msra.mxu1 %v5489_v57  ;;  %5146 = vmatprep.mubr.msk.bf16.mxu1 %vm5668_vm10, %v5666_v59  ;;  %v6330_v57 = vpack.c.bf16 %v988_v54, %v988_v54 }
 0x3c0   : > { %5132 = vmatprep.subr.bf16.mxu1 %v5666_v59 }
 0x3c1   : > { %v3188_v41 = vrot.slane %v6330_v57, 1 }
 0x3c3   : > { %5133 = vmatpush3.bf16.msra.mxu1 %v5490_v53 }
 0x3c4   : > { %5134 = vmatprep.subr.bf16.mxu1 %v5666_v59 }
 0x3c7   : > { %5135 = vmatpush3.bf16.msra.mxu1 %v5492_v3  ;;  %v5537_v3 = vld [vmem:[%s6924_s7 + $0x80] sm:$0xff]  }
 0x3c8   : > { %5136 = vmatprep.subr.bf16.mxu1 %v5666_v59 }
 0x3cb   : > { %5137 = vmatpush3.bf16.msra.mxu1 %v5494_v0 }
 0x3cc   : > { %5138 = vmatprep.subr.bf16.mxu1 %v5666_v59 }
 0x3cf   : > { %5139 = vmatpush3.bf16.msra.mxu1 %v5496_v4  ;;  %v5538_v4 = vld [vmem:[%s6922_s5 + $0x270] sm:$0xff]  }
 0x3d0   : > { %5140 = vmatprep.subr.bf16.mxu1 %v5666_v59 }
 0x3d3   : > { %5141 = vmatpush3.bf16.msra.mxu1 %v5498_v50 }
 0x3d4   : > { %5142 = vmatprep.subr.bf16.mxu1 %v5666_v59 }
 0x3d7   : > { %5143 = vmatpush3.bf16.msra.mxu1 %v5500_v62 }
 0x3d8   : > { %5144 = vmatprep.subr.bf16.mxu1 %v5666_v59 }
 0x3db   : > { %5145 = vmatpush3.bf16.msra.mxu1 %v5502_v5 }
 0x3dc   : > { %5170 = vmatprep.subr.bf16.mxu1 %v5666_v59 }
 0x3de   : > { %5147 = vmatmul.mubr.bf16.vlgmr.msra.gmra.mxu1 %v2314_v1  ;;  %v1089_v9 = vpop.f32.mrf.mxu1 }
 0x3df   : > { %v1090_v10 = vadd.f32 %v1089_v9, %v1006_v8  ;;  %5171 = vmatpush3.bf16.msra.mxu1 %v5504_v6  ;;  %5186 = vmatprep.mubr.msk.bf16.mxu1 %vm5668_vm10, %v5666_v59  ;;  %v5539_v6 = vld [vmem:[%s6924_s7 + $0xf8] sm:$0xff]   ;;  %v5540_v8 = vld [vmem:[%s6922_s5 + $0x268] sm:$0xff]  }
 0x3e0   : > { %v4908_v60 = vpop.f32.mrf.mxu1  ;;  %5172 = vmatprep.subr.bf16.mxu1 %v5666_v59 }
 0x3e1   : > { %v1095_v7 = vmax.f32 %v1090_v10, 0.0  ;;  %v5541_v10 = vld [vmem:[%s6924_s7 + $0xf0] sm:$0xff]   ;;  %v5543_v60 = vld [vmem:[%s6924_s7 + $0xe8] sm:$0xff]  }
 0x3e2   : > { %v1092_v11 = vpop.f32.mrf.mxu1 }
 0x3e3   : > { %v1096_v58 = vpack.c.bf16 %v1095_v7, %v1095_v7  ;;  %5173 = vmatpush3.bf16.msra.mxu1 %v5506_v63  ;;  %v5542_v63 = vld [vmem:[%s6922_s5 + $0x260] sm:$0xff]   ;;  %v5544_v7 = vld [vmem:[%s6922_s5 + $0x258] sm:$0xff]  }
 0x3e4   : > { %v4909_v48 = vpop.f32.mrf.mxu1  ;;  %5174 = vmatprep.subr.bf16.mxu1 %v5666_v59  ;;  %v5545_v11 = vld [vmem:[%s6924_s7 + $0xe0] sm:$0xff]  }
 0x3e5   : > { %4927 = vmatmul.mubr.bf16.vlgmr.msra.gmra.mxu0 %v1096_v58  ;;  %v5547_v58 = vld [vmem:[%s6924_s7 + $0xd8] sm:$0xff]   ;;  %v5549_v48 = vld [vmem:[%s6924_s7 + $0xd0] sm:$0xff]  }
 0x3e6   : > { %4951 = vmatpush3.bf16.msra.mxu0 %v5507_v12  ;;  %4966 = vmatprep.mubr.msk.bf16.mxu0 %vm5668_vm10, %v5666_v59  ;;  %v5546_v12 = vld [vmem:[%s6922_s5 + $0x250] sm:$0xff]  }
 0x3e7   : > { %5175 = vmatpush3.bf16.msra.mxu1 %v5508_v20  ;;  %4952 = vmatprep.subr.bf16.mxu0 %v5666_v59  ;;  %v5548_v20 = vld [vmem:[%s6922_s5 + $0x248] sm:$0xff]  }
 0x3e8   : > { %5176 = vmatprep.subr.bf16.mxu1 %v5666_v59 }
 0x3ea   : > { %4953 = vmatpush3.bf16.msra.mxu0 %v5509_v18  ;;  %v5550_v18 = vld [vmem:[%s6922_s5 + $0x240] sm:$0xff]  }
 0x3eb   : > { %5177 = vmatpush3.bf16.msra.mxu1 %v5510_v34  ;;  %4954 = vmatprep.subr.bf16.mxu0 %v5666_v59  ;;  %v5551_v34 = vld [vmem:[%s6924_s7 + $0xc8] sm:$0xff]  }
 0x3ec   : > { %5178 = vmatprep.subr.bf16.mxu1 %v5666_v59 }
 0x3ee   : > { %4955 = vmatpush3.bf16.msra.mxu0 %v5511_v37  ;;  %v5552_v37 = vld [vmem:[%s6922_s5 + $0x2b8] sm:$0xff]  }
 0x3ef   : > { %5179 = vmatpush3.bf16.msra.mxu1 %v5512_v51  ;;  %4956 = vmatprep.subr.bf16.mxu0 %v5666_v59  ;;  %v4075_v51 = vld [vmem:[%s6923_s6 + $0x3] sm:$0x1] }
 0x3f0   : > { %5180 = vmatprep.subr.bf16.mxu1 %v5666_v59 }
 0x3f2   : > { %4957 = vmatpush3.bf16.msra.mxu0 %v5513_v61  ;;  %v2968_v61 = vshrl.u32 %v6330_v57, 16 }
 0x3f3   : > { %5181 = vmatpush3.bf16.msra.mxu1 %v5514_v14  ;;  %4958 = vmatprep.subr.bf16.mxu0 %v5666_v59 }
 0x3f4   : > { %5182 = vmatprep.subr.bf16.mxu1 %v5666_v59 }
 0x3f6   : > { %4959 = vmatpush3.bf16.msra.mxu0 %v5515_v15  ;;  %v5553_v15 = vld [vmem:[%s6924_s7 + $0xc0] sm:$0xff]  }
 0x3f7   : > { %5183 = vmatpush3.bf16.msra.mxu1 %v5516_v16  ;;  %4960 = vmatprep.subr.bf16.mxu0 %v5666_v59 }
 0x3f8   : > { %5184 = vmatprep.subr.bf16.mxu1 %v5666_v59 }
 0x3fa   : > { %4961 = vmatpush3.bf16.msra.mxu0 %v5517_v17  ;;  %v5554_v17 = vld [vmem:[%s6922_s5 + $0x2b0] sm:$0xff]  }
 0x3fb   : > { %5185 = vmatpush3.bf16.msra.mxu1 %v5518_v19  ;;  %4962 = vmatprep.subr.bf16.mxu0 %v5666_v59 }
 0x3fc   : > { %5210 = vmatprep.subr.bf16.mxu1 %v5666_v59 }
 0x3fe   : > { %v1307_v25 = vpop.f32.mrf.mxu1  ;;  %4963 = vmatpush3.bf16.msra.mxu0 %v5519_v21  ;;  %5187 = vmatmul.mubr.bf16.vlgmr.msra.gmra.mxu1 %v2532_v24 }
 0x3ff   : > { %v1308_v27 = vadd.f32 %v3975_v23, %v1307_v25  ;;  %5211 = vmatpush3.bf16.msra.mxu1 %v5520_v22  ;;  %4964 = vmatprep.subr.bf16.mxu0 %v5666_v59  ;;  %v5555_v23 = vld [vmem:[%s6924_s7 + $0x138] sm:$0xff]   ;;  %v5556_v25 = vld [vmem:[%s6922_s5 + $0x2a8] sm:$0xff]  }
 0x400   : > { %v4948_v31 = vpop.f32.mrf.mxu1  ;;  %5212 = vmatprep.subr.bf16.mxu1 %v5666_v59  ;;  %5226 = vmatprep.mubr.msk.bf16.mxu1 %vm5668_vm10, %v5666_v59 }
 0x401   : > { %v1313_v13 = vmax.f32 %v1308_v27, 0.0  ;;  %v5557_v27 = vld [vmem:[%s6924_s7 + $0x130] sm:$0xff]   ;;  %v5559_v31 = vld [vmem:[%s6924_s7 + $0x128] sm:$0xff]  }
 0x402   : > { %v1310_v32 = vpop.f32.mrf.mxu1  ;;  %4965 = vmatpush3.bf16.msra.mxu0 %v5521_v26 }
 0x403   : > { %v1314_v35 = vpack.c.bf16 %v1313_v13, %v1313_v13  ;;  %5213 = vmatpush3.bf16.msra.mxu1 %v5522_v29  ;;  %4990 = vmatprep.subr.bf16.mxu0 %v5666_v59  ;;  %v5558_v29 = vld [vmem:[%s6922_s5 + $0x2a0] sm:$0xff]   ;;  %v5560_v13 = vld [vmem:[%s6922_s5 + $0x298] sm:$0xff]  }
 0x404   : > { %v4949_v38 = vpop.f32.mrf.mxu1  ;;  %5214 = vmatprep.subr.bf16.mxu1 %v5666_v59  ;;  %v5561_v32 = vld [vmem:[%s6924_s7 + $0x120] sm:$0xff]  }
 0x405   : > { %4967 = vmatmul.mubr.bf16.vlgmr.msra.gmra.mxu0 %v1314_v35  ;;  %v5563_v35 = vld [vmem:[%s6924_s7 + $0x118] sm:$0xff]   ;;  %v5565_v38 = vld [vmem:[%s6924_s7 + $0x110] sm:$0xff]  }
 0x406   : > { %4991 = vmatpush3.bf16.msra.mxu0 %v5523_v33  ;;  %5006 = vmatprep.mubr.msk.bf16.mxu0 %vm5668_vm10, %v5666_v59  ;;  %v5562_v33 = vld [vmem:[%s6922_s5 + $0x290] sm:$0xff]  }
 0x407   : > { %5215 = vmatpush3.bf16.msra.mxu1 %v5524_v36  ;;  %4992 = vmatprep.subr.bf16.mxu0 %v5666_v59  ;;  %v5564_v36 = vld [vmem:[%s6922_s5 + $0x288] sm:$0xff]  }
 0x408   : > { %5216 = vmatprep.subr.bf16.mxu1 %v5666_v59 }
 0x40a   : > { %4993 = vmatpush3.bf16.msra.mxu0 %v5525_v28  ;;  %v5566_v28 = vld [vmem:[%s6922_s5 + $0x280] sm:$0xff]  }
 0x40b   : > { %5217 = vmatpush3.bf16.msra.mxu1 %v5526_v39  ;;  %4994 = vmatprep.subr.bf16.mxu0 %v5666_v59  ;;  %v5567_v39 = vld [vmem:[%s6924_s7 + $0x108] sm:$0xff]  }
 0x40c   : > { %5218 = vmatprep.subr.bf16.mxu1 %v5666_v59 }
 0x40e   : > { %4995 = vmatpush3.bf16.msra.mxu0 %v5527_v40  ;;  %v5568_v40 = vld [vmem:[%s6922_s5 + $0x2f8] sm:$0xff]  }
 0x40f   : > { %5219 = vmatpush3.bf16.msra.mxu1 %v5528_v30  ;;  %4996 = vmatprep.subr.bf16.mxu0 %v5666_v59  ;;  %v4125_v30 = vld [vmem:[%s6923_s6 + $0x4] sm:$0x1] }
 0x410   : > { %5220 = vmatprep.subr.bf16.mxu1 %v5666_v59 }
 0x412   : > { %4997 = vmatpush3.bf16.msra.mxu0 %v5529_v42 }
 0x413   : > { %5221 = vmatpush3.bf16.msra.mxu1 %v5530_v43  ;;  %4998 = vmatprep.subr.bf16.mxu0 %v5666_v59  ;;  %v5569_v43 = vld [vmem:[%s6924_s7 + $0x100] sm:$0xff]  }
 0x414   : > { %5222 = vmatprep.subr.bf16.mxu1 %v5666_v59 }
 0x416   : > { %4999 = vmatpush3.bf16.msra.mxu0 %v5531_v45  ;;  %v5570_v45 = vld [vmem:[%s6922_s5 + $0x2f0] sm:$0xff]  }
 0x417   : > { %5223 = vmatpush3.bf16.msra.mxu1 %v5532_v47  ;;  %5000 = vmatprep.subr.bf16.mxu0 %v5666_v59 }
 0x418   : > { %5224 = vmatprep.subr.bf16.mxu1 %v5666_v59 }
 0x41a   : > { %5001 = vmatpush3.bf16.msra.mxu0 %v5533_v46 }
 0x41b   : > { %5225 = vmatpush3.bf16.msra.mxu1 %v5534_v52  ;;  %5002 = vmatprep.subr.bf16.mxu0 %v5666_v59  ;;  %v5571_v52 = vld [vmem:[%s6924_s7 + $0x178] sm:$0xff]  }
 0x41c   : > { %5250 = vmatprep.subr.bf16.mxu1 %v5666_v59 }
 0x41e   : > { %v1526_v53 = vpop.f32.mrf.mxu1  ;;  %5003 = vmatpush3.bf16.msra.mxu0 %v5535_v55  ;;  %5227 = vmatmul.mubr.bf16.vlgmr.msra.gmra.mxu1 %v6330_v57  ;;  %v5572_v55 = vld [vmem:[%s6922_s5 + $0x2e8] sm:$0xff]  }
 0x41f   : > { %v1527_v0 = vadd.f32 %v4025_v2, %v1526_v53  ;;  %5251 = vmatpush3.bf16.msra.mxu1 %v5536_v56  ;;  %5004 = vmatprep.subr.bf16.mxu0 %v5666_v59  ;;  %v5573_v2 = vld [vmem:[%s6924_s7 + $0x170] sm:$0xff]   ;;  %v5574_v53 = vld [vmem:[%s6922_s5 + $0x2e0] sm:$0xff]  }
 0x420   : > { %v4988_v50 = vpop.f32.mrf.mxu1  ;;  %5252 = vmatprep.subr.bf16.mxu1 %v5666_v59  ;;  %5266 = vmatprep.mubr.msk.bf16.mxu1 %vm5668_vm10, %v5666_v59 }
 0x421   : > { %v1532_v62 = vmax.f32 %v1527_v0, 0.0  ;;  %v5576_v0 = vld [vmem:[%s6922_s5 + $0x2d8] sm:$0xff]   ;;  %v5578_v50 = vld [vmem:[%s6922_s5 + $0x2d0] sm:$0xff]  }
 0x422   : > { %v1529_v5 = vpop.f32.mrf.mxu1  ;;  %5005 = vmatpush3.bf16.msra.mxu0 %v5537_v3  ;;  %v5575_v3 = vld [vmem:[%s6924_s7 + $0x168] sm:$0xff]  }
 0x423   : > { %v1533_v1 = vpack.c.bf16 %v1532_v62, %v1532_v62  ;;  %5253 = vmatpush3.bf16.msra.mxu1 %v5538_v4  ;;  %5030 = vmatprep.subr.bf16.mxu0 %v5666_v59  ;;  %v5577_v4 = vld [vmem:[%s6924_s7 + $0x160] sm:$0xff]   ;;  %v5579_v62 = vld [vmem:[%s6924_s7 + $0x158] sm:$0xff]   ;;  %v5580_v5 = vld [vmem:[%s6922_s5 + $0x2c8] sm:$0xff]  }
 0x424   : > { %v4989_v9 = vpop.f32.mrf.mxu1  ;;  %5254 = vmatprep.subr.bf16.mxu1 %v5666_v59 }
 0x425   : > { %5007 = vmatmul.mubr.bf16.vlgmr.msra.gmra.mxu0 %v1533_v1  ;;  %v5582_v1 = vld [vmem:[%s6922_s5 + $0x2c0] sm:$0xff]   ;;  %v5584_v9 = vld [vmem:[%s6922_s5 + $0x338] sm:$0xff]  }
 0x426   : > { %5031 = vmatpush3.bf16.msra.mxu0 %v5539_v6  ;;  %5046 = vmatprep.mubr.msk.bf16.mxu0 %vm5668_vm10, %v5666_v59  ;;  %v5581_v6 = vld [vmem:[%s6924_s7 + $0x150] sm:$0xff]  }
 0x427   : > { %5255 = vmatpush3.bf16.msra.mxu1 %v5540_v8  ;;  %5032 = vmatprep.subr.bf16.mxu0 %v5666_v59  ;;  %v5583_v8 = vld [vmem:[%s6924_s7 + $0x148] sm:$0xff]  }
 0x428   : > { %5256 = vmatprep.subr.bf16.mxu1 %v5666_v59 }
 0x42a   : > { %5033 = vmatpush3.bf16.msra.mxu0 %v5541_v10  ;;  %v4175_v10 = vld [vmem:[%s6923_s6 + $0x5] sm:$0x1] }
 0x42b   : > { %5257 = vmatpush3.bf16.msra.mxu1 %v5542_v63  ;;  %5034 = vmatprep.subr.bf16.mxu0 %v5666_v59  ;;  %v3406_v63 = vrot.slane %v2968_v61, 1 }
 0x42c   : > { %5258 = vmatprep.subr.bf16.mxu1 %v5666_v59 }
 0x42e   : > { %5035 = vmatpush3.bf16.msra.mxu0 %v5543_v60 }
 0x42f   : > { %5259 = vmatpush3.bf16.msra.mxu1 %v5544_v7  ;;  %5036 = vmatprep.subr.bf16.mxu0 %v5666_v59  ;;  %v5585_v7 = vld [vmem:[%s6924_s7 + $0x140] sm:$0xff]  }
 0x430   : > { %5260 = vmatprep.subr.bf16.mxu1 %v5666_v59 }
 0x432   : > { %5037 = vmatpush3.bf16.msra.mxu0 %v5545_v11 }
 0x433   : > { %5261 = vmatpush3.bf16.msra.mxu1 %v5546_v12  ;;  %5038 = vmatprep.subr.bf16.mxu0 %v5666_v59  ;;  %v5586_v12 = vld [vmem:[%s6922_s5 + $0x330] sm:$0xff]  }
 0x434   : > { %5262 = vmatprep.subr.bf16.mxu1 %v5666_v59 }
 0x436   : > { %5039 = vmatpush3.bf16.msra.mxu0 %v5547_v58 }
 0x437   : > { %5263 = vmatpush3.bf16.msra.mxu1 %v5548_v20  ;;  %5040 = vmatprep.subr.bf16.mxu0 %v5666_v59 }
 0x438   : > { %5264 = vmatprep.subr.bf16.mxu1 %v5666_v59 }
 0x43a   : > { %5041 = vmatpush3.bf16.msra.mxu0 %v5549_v48 }
 0x43b   : > { %5265 = vmatpush3.bf16.msra.mxu1 %v5550_v18  ;;  %5042 = vmatprep.subr.bf16.mxu0 %v5666_v59  ;;  %v5587_v18 = vld [vmem:[%s6924_s7 + $0x1b8] sm:$0xff]  }
 0x43c   : > { %5290 = vmatprep.subr.bf16.mxu1 %v5666_v59 }
 0x43e   : > { %v1744_v14 = vpop.f32.mrf.mxu1  ;;  %5043 = vmatpush3.bf16.msra.mxu0 %v5551_v34  ;;  %5267 = vmatmul.mubr.bf16.vlgmr.msra.gmra.mxu1 %v2968_v61  ;;  %v5589_v61 = vld [vmem:[%s6924_s7 + $0x1b0] sm:$0xff]  }
 0x43f   : > { %v1745_v16 = vadd.f32 %v4075_v51, %v1744_v14  ;;  %5291 = vmatpush3.bf16.msra.mxu1 %v5552_v37  ;;  %5044 = vmatprep.subr.bf16.mxu0 %v5666_v59  ;;  %v5588_v37 = vld [vmem:[%s6922_s5 + $0x328] sm:$0xff]   ;;  %v5590_v14 = vld [vmem:[%s6922_s5 + $0x320] sm:$0xff]  }
 0x440   : > { %v5028_v19 = vpop.f32.mrf.mxu1  ;;  %5292 = vmatprep.subr.bf16.mxu1 %v5666_v59  ;;  %5306 = vmatprep.mubr.msk.bf16.mxu1 %vm5668_vm10, %v5666_v59 }
 0x441   : > { %v1750_v21 = vmax.f32 %v1745_v16, 0.0  ;;  %v5592_v16 = vld [vmem:[%s6922_s5 + $0x318] sm:$0xff]   ;;  %v5594_v19 = vld [vmem:[%s6922_s5 + $0x310] sm:$0xff]  }
 0x442   : > { %v1747_v22 = vpop.f32.mrf.mxu1  ;;  %5045 = vmatpush3.bf16.msra.mxu0 %v5553_v15  ;;  %v5591_v15 = vld [vmem:[%s6924_s7 + $0x1a8] sm:$0xff]  }
 0x443   : > { %v1751_v24 = vpack.c.bf16 %v1750_v21, %v1750_v21  ;;  %5293 = vmatpush3.bf16.msra.mxu1 %v5554_v17  ;;  %5070 = vmatprep.subr.bf16.mxu0 %v5666_v59  ;;  %v5593_v17 = vld [vmem:[%s6924_s7 + $0x1a0] sm:$0xff]   ;;  %v5595_v21 = vld [vmem:[%s6924_s7 + $0x198] sm:$0xff]   ;;  %v5596_v22 = vld [vmem:[%s6922_s5 + $0x308] sm:$0xff]  }
 0x444   : > { %v5029_v26 = vpop.f32.mrf.mxu1  ;;  %5294 = vmatprep.subr.bf16.mxu1 %v5666_v59 }
 0x445   : > { %5047 = vmatmul.mubr.bf16.vlgmr.msra.gmra.mxu0 %v1751_v24  ;;  %v5598_v24 = vld [vmem:[%s6922_s5 + $0x300] sm:$0xff]  }
 0x446   : > { %5071 = vmatpush3.bf16.msra.mxu0 %v5555_v23  ;;  %5086 = vmatprep.mubr.msk.bf16.mxu0 %vm5668_vm10, %v5666_v59  ;;  %v5597_v23 = vld [vmem:[%s6924_s7 + $0x190] sm:$0xff]   ;;  %v4225_v26 = vld [vmem:[%s6923_s6 + $0x6] sm:$0x1] }
 0x447   : > { %5295 = vmatpush3.bf16.msra.mxu1 %v5556_v25  ;;  %5072 = vmatprep.subr.bf16.mxu0 %v5666_v59  ;;  %v5599_v25 = vld [vmem:[%s6924_s7 + $0x188] sm:$0xff]  }
 0x448   : > { %5296 = vmatprep.subr.bf16.mxu1 %v5666_v59 }
 0x44a   : > { %5073 = vmatpush3.bf16.msra.mxu0 %v5557_v27  ;;  %v3624_v27 = vrot.slane %v6330_v57, 2 }
 0x44b   : > { %5297 = vmatpush3.bf16.msra.mxu1 %v5558_v29  ;;  %5074 = vmatprep.subr.bf16.mxu0 %v5666_v59 }
 0x44c   : > { %5298 = vmatprep.subr.bf16.mxu1 %v5666_v59 }
 0x44e   : > { %5075 = vmatpush3.bf16.msra.mxu0 %v5559_v31  ;;  %v5600_v31 = vld [vmem:[%s6924_s7 + $0x180] sm:$0xff]  }
 0x44f   : > { %5299 = vmatpush3.bf16.msra.mxu1 %v5560_v13  ;;  %5076 = vmatprep.subr.bf16.mxu0 %v5666_v59 }
 0x450   : > { %5300 = vmatprep.subr.bf16.mxu1 %v5666_v59 }
 0x452   : > { %5077 = vmatpush3.bf16.msra.mxu0 %v5561_v32 }
 0x453   : > { %5301 = vmatpush3.bf16.msra.mxu1 %v5562_v33  ;;  %5078 = vmatprep.subr.bf16.mxu0 %v5666_v59 }
 0x454   : > { %5302 = vmatprep.subr.bf16.mxu1 %v5666_v59 }
 0x456   : > { %5079 = vmatpush3.bf16.msra.mxu0 %v5563_v35 }
 0x457   : > { %5303 = vmatpush3.bf16.msra.mxu1 %v5564_v36  ;;  %5080 = vmatprep.subr.bf16.mxu0 %v5666_v59  ;;  %v5601_v36 = vld [vmem:[%s6924_s7 + $0x1f8] sm:$0xff]  }
 0x458   : > { %5304 = vmatprep.subr.bf16.mxu1 %v5666_v59 }
 0x45a   : > { %5081 = vmatpush3.bf16.msra.mxu0 %v5565_v38  ;;  %v1113_v38 = vld [vmem:[%s6925_s8] sm:$0x1] }
 0x45b   : > { %5305 = vmatpush3.bf16.msra.mxu1 %v5566_v28  ;;  %5082 = vmatprep.subr.bf16.mxu0 %v5666_v59 }
 0x45c   : > { %5330 = vmatprep.subr.bf16.mxu1 %v5666_v59 }
 0x45e   : > { %v1962_v42 = vpop.f32.mrf.mxu1  ;;  %5083 = vmatpush3.bf16.msra.mxu0 %v5567_v39  ;;  %5307 = vmatmul.mubr.bf16.vlgmr.msra.gmra.mxu1 %v3188_v41 }
 0x45f   : > { %v1963_v44 = vadd.f32 %v4125_v30, %v1962_v42  ;;  %5331 = vmatpush3.bf16.msra.mxu1 %v5568_v40  ;;  %5084 = vmatprep.subr.bf16.mxu0 %v5666_v59  ;;  %v5602_v30 = vld [vmem:[%s6924_s7 + $0x1f0] sm:$0xff]  }
 0x460   : > { %v5068_v47 = vpop.f32.mrf.mxu1  ;;  %5332 = vmatprep.subr.bf16.mxu1 %v5666_v59  ;;  %5346 = vmatprep.mubr.msk.bf16.mxu1 %vm5668_vm10, %v5666_v59 }
 0x461   : > { %v1968_v49 = vmax.f32 %v1963_v44, 0.0  ;;  %v5605_v47 = vld [vmem:[%s6924_s7 + $0x1d8] sm:$0xff]  }
 0x462   : > { %v1965_v46 = vpop.f32.mrf.mxu1  ;;  %5085 = vmatpush3.bf16.msra.mxu0 %v5569_v43  ;;  %v5603_v43 = vld [vmem:[%s6924_s7 + $0x1e8] sm:$0xff]  }
 0x463   : > { %v1969_v54 = vpack.c.bf16 %v1968_v49, %v1968_v49  ;;  %5333 = vmatpush3.bf16.msra.mxu1 %v5570_v45  ;;  %5110 = vmatprep.subr.bf16.mxu0 %v5666_v59  ;;  %v5604_v45 = vld [vmem:[%s6924_s7 + $0x1e0] sm:$0xff]   ;;  %v5606_v49 = vld [vmem:[%s6924_s7 + $0x1d0] sm:$0xff]   ;;  %v5607_v46 = vld [vmem:[%s6924_s7 + $0x1c8] sm:$0xff]  }
 0x464   : > { %v5069_v56 = vpop.f32.mrf.mxu1  ;;  %5334 = vmatprep.subr.bf16.mxu1 %v5666_v59 }
 0x465   : > { %5087 = vmatmul.mubr.bf16.vlgmr.msra.gmra.mxu0 %v1969_v54 }
 0x466   : > { %5111 = vmatpush3.bf16.msra.mxu0 %v5571_v52  ;;  %5126 = vmatprep.mubr.msk.bf16.mxu0 %vm5668_vm10, %v5666_v59  ;;  %v4275_v52 = vld [vmem:[%s6923_s6 + $0x7] sm:$0x1] }
 0x467   : > { %5335 = vmatpush3.bf16.msra.mxu1 %v5572_v55  ;;  %5112 = vmatprep.subr.bf16.mxu0 %v5666_v59  ;;  %v5608_v55 = vld [vmem:[%s6924_s7 + $0x1c0] sm:$0xff]  }
 0x468   : > { %5336 = vmatprep.subr.bf16.mxu1 %v5666_v59 }
 0x46a   : > { %5113 = vmatpush3.bf16.msra.mxu0 %v5573_v2 }
 0x46b   : > { %5337 = vmatpush3.bf16.msra.mxu1 %v5574_v53  ;;  %5114 = vmatprep.subr.bf16.mxu0 %v5666_v59 }
 0x46c   : > { %5338 = vmatprep.subr.bf16.mxu1 %v5666_v59 }
 0x46e   : > { %5115 = vmatpush3.bf16.msra.mxu0 %v5575_v3 }
 0x46f   : > { %5339 = vmatpush3.bf16.msra.mxu1 %v5576_v0  ;;  %5116 = vmatprep.subr.bf16.mxu0 %v5666_v59  ;;  %v5609_v0 = vld [vmem:[%s6924_s7 + $0x238] sm:$0xff]  }
 0x470   : > { %5340 = vmatprep.subr.bf16.mxu1 %v5666_v59 }
 0x472   : > { %5117 = vmatpush3.bf16.msra.mxu0 %v5577_v4 }
 0x473   : > { %5341 = vmatpush3.bf16.msra.mxu1 %v5578_v50  ;;  %5118 = vmatprep.subr.bf16.mxu0 %v5666_v59  ;;  %v4000_v50 = vld [vmem:[%s6925_s8 + $0x1] sm:$0x1] }
 0x474   : > { %5342 = vmatprep.subr.bf16.mxu1 %v5666_v59 }
 0x476   : > { %5119 = vmatpush3.bf16.msra.mxu0 %v5579_v62 }
 0x477   : > { %5343 = vmatpush3.bf16.msra.mxu1 %v5580_v5  ;;  %5120 = vmatprep.subr.bf16.mxu0 %v5666_v59 }
 0x478   : > { %5344 = vmatprep.subr.bf16.mxu1 %v5666_v59 }
 0x47a   : > { %5121 = vmatpush3.bf16.msra.mxu0 %v5581_v6 }
 0x47b   : > { %5345 = vmatpush3.bf16.msra.mxu1 %v5582_v1  ;;  %5122 = vmatprep.subr.bf16.mxu0 %v5666_v59  ;;  %v5610_v1 = vld [vmem:[%s6924_s7 + $0x230] sm:$0xff]  }
 0x47c   : > { %5370 = vmatprep.subr.bf16.mxu1 %v5666_v59 }
 0x47e   : > { %v2180_v60 = vpop.f32.mrf.mxu1  ;;  %5123 = vmatpush3.bf16.msra.mxu0 %v5583_v8  ;;  %5347 = vmatmul.mubr.bf16.vlgmr.msra.gmra.mxu1 %v3406_v63 }
 0x47f   : > { %v2181_v11 = vadd.f32 %v4175_v10, %v2180_v60  ;;  %5371 = vmatpush3.bf16.msra.mxu1 %v5584_v9  ;;  %5124 = vmatprep.subr.bf16.mxu0 %v5666_v59  ;;  %v5611_v10 = vld [vmem:[%s6924_s7 + $0x228] sm:$0xff]   ;;  %v5612_v60 = vld [vmem:[%s6924_s7 + $0x220] sm:$0xff]  }
 0x480   : > { %v5108_v58 = vpop.f32.mrf.mxu1  ;;  %5372 = vmatprep.subr.bf16.mxu1 %v5666_v59  ;;  %5386 = vmatprep.mubr.msk.bf16.mxu1 %vm5668_vm10, %v5666_v59 }
 0x481   : > { %v2186_v20 = vmax.f32 %v2181_v11, 0.0  ;;  %v5614_v11 = vld [vmem:[%s6924_s7 + $0x210] sm:$0xff]   ;;  %v4325_v58 = vld [vmem:[%s6923_s6 + $0x8] sm:$0x1] }
 0x482   : > { %v2183_v48 = vpop.f32.mrf.mxu1  ;;  %5125 = vmatpush3.bf16.msra.mxu0 %v5585_v7  ;;  %v5613_v7 = vld [vmem:[%s6924_s7 + $0x218] sm:$0xff]  }
 0x483   : > { %v2187_v34 = vpack.c.bf16 %v2186_v20, %v2186_v20  ;;  %5373 = vmatpush3.bf16.msra.mxu1 %v5586_v12  ;;  %5150 = vmatprep.subr.bf16.mxu0 %v5666_v59  ;;  %v5615_v12 = vld [vmem:[%s6924_s7 + $0x208] sm:$0xff]   ;;  %v5616_v48 = vld [vmem:[%s6924_s7 + $0x200] sm:$0xff]  }
 0x484   : > { %v5109_v51 = vpop.f32.mrf.mxu1  ;;  %5374 = vmatprep.subr.bf16.mxu1 %v5666_v59 }
 0x485   : > { %5127 = vmatmul.mubr.bf16.vlgmr.msra.gmra.mxu0 %v2187_v34 }
 0x486   : > { %5151 = vmatpush3.bf16.msra.mxu0 %v5587_v18  ;;  %5166 = vmatprep.mubr.msk.bf16.mxu0 %vm5668_vm10, %v5666_v59 }
 0x487   : > { %5375 = vmatpush3.bf16.msra.mxu1 %v5588_v37  ;;  %5152 = vmatprep.subr.bf16.mxu0 %v5666_v59 }
 0x488   : > { %5376 = vmatprep.subr.bf16.mxu1 %v5666_v59 }
 0x48a   : > { %5153 = vmatpush3.bf16.msra.mxu0 %v5589_v61  ;;  %v5617_v61 = vld [vmem:[%s6924_s7 + $0x278] sm:$0xff]  }
 0x48b   : > { %5377 = vmatpush3.bf16.msra.mxu1 %v5590_v14  ;;  %5154 = vmatprep.subr.bf16.mxu0 %v5666_v59 }
 0x48c   : > { %5378 = vmatprep.subr.bf16.mxu1 %v5666_v59 }
 0x48e   : > { %5155 = vmatpush3.bf16.msra.mxu0 %v5591_v15  ;;  %v4050_v15 = vld [vmem:[%s6925_s8 + $0x2] sm:$0x1] }
 0x48f   : > { %5379 = vmatpush3.bf16.msra.mxu1 %v5592_v16  ;;  %5156 = vmatprep.subr.bf16.mxu0 %v5666_v59 }
 0x490   : > { %5380 = vmatprep.subr.bf16.mxu1 %v5666_v59 }
 0x492   : > { %5157 = vmatpush3.bf16.msra.mxu0 %v5593_v17 }
 0x493   : > { %5381 = vmatpush3.bf16.msra.mxu1 %v5594_v19  ;;  %5158 = vmatprep.subr.bf16.mxu0 %v5666_v59 }
 0x494   : > { %5382 = vmatprep.subr.bf16.mxu1 %v5666_v59 }
 0x496   : > { %5159 = vmatpush3.bf16.msra.mxu0 %v5595_v21  ;;  %v5618_v21 = vld [vmem:[%s6924_s7 + $0x270] sm:$0xff]  }
 0x497   : > { %5383 = vmatpush3.bf16.msra.mxu1 %v5596_v22  ;;  %5160 = vmatprep.subr.bf16.mxu0 %v5666_v59 }
 0x498   : > { %5384 = vmatprep.subr.bf16.mxu1 %v5666_v59 }
 0x49a   : > { %5161 = vmatpush3.bf16.msra.mxu0 %v5597_v23 }
 0x49b   : > { %5385 = vmatpush3.bf16.msra.mxu1 %v5598_v24  ;;  %5162 = vmatprep.subr.bf16.mxu0 %v5666_v59  ;;  %v5619_v24 = vld [vmem:[%s6924_s7 + $0x268] sm:$0xff]  }
 0x49e   : > { %v2398_v29 = vpop.f32.mrf.mxu1  ;;  %5163 = vmatpush3.bf16.msra.mxu0 %v5599_v25  ;;  %5387 = vmatmul.mubr.bf16.vlgmr.msra.gmra.mxu1 %v3624_v27  ;;  %v5621_v27 = vld [vmem:[%s6924_s7 + $0x258] sm:$0xff]  }
 0x49f   : > { %v2399_v13 = vadd.f32 %v4225_v26, %v2398_v29  ;;  %5164 = vmatprep.subr.bf16.mxu0 %v5666_v59  ;;  %v5620_v26 = vld [vmem:[%s6924_s7 + $0x260] sm:$0xff]   ;;  %v5622_v29 = vld [vmem:[%s6924_s7 + $0x250] sm:$0xff]  }
 0x4a0   : > { %v5148_v32 = vpop.f32.mrf.mxu1 }
 0x4a1   : > { %v2404_v33 = vmax.f32 %v2399_v13, 0.0  ;;  %v4375_v13 = vld [vmem:[%s6923_s6 + $0x9] sm:$0x1] }
 0x4a2   : > { %v2401_v35 = vpop.f32.mrf.mxu1  ;;  %5165 = vmatpush3.bf16.msra.mxu0 %v5600_v31  ;;  %v5623_v31 = vld [vmem:[%s6924_s7 + $0x248] sm:$0xff]  }
 0x4a3   : > { %v2405_v57 = vpack.c.bf16 %v2404_v33, %v2404_v33  ;;  %5190 = vmatprep.subr.bf16.mxu0 %v5666_v59  ;;  %v5624_v33 = vld [vmem:[%s6924_s7 + $0x240] sm:$0xff]  }
 0x4a4   : > { %v5149_v28 = vpop.f32.mrf.mxu1 }
 0x4a5   : > { %5167 = vmatmul.mubr.bf16.vlgmr.msra.gmra.mxu0 %v2405_v57  ;;  %v1196_v39 = vpop.f32.mrf.mxu0  ;;  %v5625_v28 = vld [vmem:[%s6924_s7 + $0x2b8] sm:$0xff]  }
 0x4a6   : > { %v1197_v40 = vadd.f32 %v1196_v39, %v1113_v38  ;;  %5191 = vmatpush3.bf16.msra.mxu0 %v5601_v36  ;;  %5206 = vmatprep.mubr.msk.bf16.mxu0 %vm5668_vm10, %v5666_v59 }
 0x4a7   : > { %v4928_v41 = vpop.f32.mrf.mxu0  ;;  %5192 = vmatprep.subr.bf16.mxu0 %v5666_v59 }
 0x4a8   : > { %3823 = vst [vmem:[%s6364_s27] sm:$0x1] %v1197_v40  ;;  %v4100_v40 = vld [vmem:[%s6925_s8 + $0x3] sm:$0x1] }
 0x4a9   : > { %v1199_v42 = vpop.f32.mrf.mxu0 }
 0x4aa   : > { %5193 = vmatpush3.bf16.msra.mxu0 %v5602_v30 }
 0x4ab   : > { %v4929_v44 = vpop.f32.mrf.mxu0  ;;  %5194 = vmatprep.subr.bf16.mxu0 %v5666_v59 }
 0x4ae   : > { %5195 = vmatpush3.bf16.msra.mxu0 %v5603_v43  ;;  %v5626_v43 = vld [vmem:[%s6924_s7 + $0x2b0] sm:$0xff]  }
 0x4af   : > { %5196 = vmatprep.subr.bf16.mxu0 %v5666_v59 }
 0x4b2   : > { %5197 = vmatpush3.bf16.msra.mxu0 %v5604_v45 }
 0x4b3   : > { %5198 = vmatprep.subr.bf16.mxu0 %v5666_v59 }
 0x4b6   : > { %5199 = vmatpush3.bf16.msra.mxu0 %v5605_v47  ;;  %v5627_v47 = vld [vmem:[%s6924_s7 + $0x2a8] sm:$0xff]  }
 0x4b7   : > { %5200 = vmatprep.subr.bf16.mxu0 %v5666_v59 }
 0x4ba   : > { %5201 = vmatpush3.bf16.msra.mxu0 %v5606_v49 }
 0x4bb   : > { %5202 = vmatprep.subr.bf16.mxu0 %v5666_v59 }
 0x4be   : > { %v2616_v54 = vpop.f32.mrf.mxu1  ;;  %5203 = vmatpush3.bf16.msra.mxu0 %v5607_v46  ;;  %v5628_v46 = vld [vmem:[%s6924_s7 + $0x2a0] sm:$0xff]  }
 0x4bf   : > { %v2617_v56 = vadd.f32 %v4275_v52, %v2616_v54  ;;  %5204 = vmatprep.subr.bf16.mxu0 %v5666_v59  ;;  %v5629_v52 = vld [vmem:[%s6924_s7 + $0x298] sm:$0xff]   ;;  %v5630_v54 = vld [vmem:[%s6924_s7 + $0x290] sm:$0xff]  }
 0x4c0   : > { %v5188_v2 = vpop.f32.mrf.mxu1 }
 0x4c1   : > { %v2622_v53 = vmax.f32 %v2617_v56, 0.0  ;;  %v4425_v56 = vld [vmem:[%s6923_s6 + $0xa] sm:$0x1] }
 0x4c2   : > { %v2619_v3 = vpop.f32.mrf.mxu1  ;;  %5205 = vmatpush3.bf16.msra.mxu0 %v5608_v55  ;;  %v5631_v55 = vld [vmem:[%s6924_s7 + $0x288] sm:$0xff]  }
 0x4c3   : > { %v2623_v4 = vpack.c.bf16 %v2622_v53, %v2622_v53  ;;  %5230 = vmatprep.subr.bf16.mxu0 %v5666_v59  ;;  %v5632_v53 = vld [vmem:[%s6924_s7 + $0x280] sm:$0xff]  }
 0x4c4   : > { %v5189_v62 = vpop.f32.mrf.mxu1 }
 0x4c5   : > { %v1416_v5 = vpop.f32.mrf.mxu0  ;;  %5207 = vmatmul.mubr.bf16.vlgmr.msra.gmra.mxu0 %v2623_v4  ;;  %v5633_v62 = vld [vmem:[%s6924_s7 + $0x2f8] sm:$0xff]  }
 0x4c6   : > { %v1417_v6 = vadd.f32 %v4000_v50, %v1416_v5  ;;  %5231 = vmatpush3.bf16.msra.mxu0 %v5609_v0  ;;  %5246 = vmatprep.mubr.msk.bf16.mxu0 %vm5668_vm10, %v5666_v59 }
 0x4c7   : > { %v4968_v8 = vpop.f32.mrf.mxu0  ;;  %5232 = vmatprep.subr.bf16.mxu0 %v5666_v59 }
 0x4c8   : > { %3824 = vst [vmem:[%s6364_s27 + $0x1] sm:$0x1] %v1417_v6  ;;  %v4150_v6 = vld [vmem:[%s6925_s8 + $0x4] sm:$0x1] }
 0x4c9   : > { %v1419_v9 = vpop.f32.mrf.mxu0 }
 0x4ca   : > { %5233 = vmatpush3.bf16.msra.mxu0 %v5610_v1 }
 0x4cb   : > { %v4969_v63 = vpop.f32.mrf.mxu0  ;;  %5234 = vmatprep.subr.bf16.mxu0 %v5666_v59 }
 0x4ce   : > { %5235 = vmatpush3.bf16.msra.mxu0 %v5611_v10  ;;  %v5634_v10 = vld [vmem:[%s6924_s7 + $0x2f0] sm:$0xff]  }
 0x4cf   : > { %5236 = vmatprep.subr.bf16.mxu0 %v5666_v59 }
 0x4d2   : > { %5237 = vmatpush3.bf16.msra.mxu0 %v5612_v60 }
 0x4d3   : > { %5238 = vmatprep.subr.bf16.mxu0 %v5666_v59 }
 0x4d6   : > { %5239 = vmatpush3.bf16.msra.mxu0 %v5613_v7  ;;  %v5635_v7 = vld [vmem:[%s6924_s7 + $0x2e8] sm:$0xff]  }
 0x4d7   : > { %5240 = vmatprep.subr.bf16.mxu0 %v5666_v59 }
 0x4da   : > { %5241 = vmatpush3.bf16.msra.mxu0 %v5614_v11 }
 0x4db   : > { %5242 = vmatprep.subr.bf16.mxu0 %v5666_v59 }
 0x4de   : > { %v2833_v20 = vpop.f32.mrf.mxu1  ;;  %5243 = vmatpush3.bf16.msra.mxu0 %v5615_v12  ;;  %v5636_v12 = vld [vmem:[%s6924_s7 + $0x2e0] sm:$0xff]  }
 0x4df   : > { %v2834_v18 = vadd.f32 %v4325_v58, %v2833_v20  ;;  %5244 = vmatprep.subr.bf16.mxu0 %v5666_v59  ;;  %v5637_v58 = vld [vmem:[%s6924_s7 + $0x2d8] sm:$0xff]   ;;  %v5638_v20 = vld [vmem:[%s6924_s7 + $0x2d0] sm:$0xff]  }
 0x4e0   : > { %v5228_v34 = vpop.f32.mrf.mxu1 }
 0x4e1   : > { %v2839_v37 = vmax.f32 %v2834_v18, 0.0  ;;  %v4475_v18 = vld [vmem:[%s6923_s6 + $0xb] sm:$0x1] }
 0x4e2   : > { %v2836_v51 = vpop.f32.mrf.mxu1  ;;  %5245 = vmatpush3.bf16.msra.mxu0 %v5616_v48  ;;  %v5639_v48 = vld [vmem:[%s6924_s7 + $0x2c8] sm:$0xff]  }
 0x4e3   : > { %v2840_v14 = vpack.c.bf16 %v2839_v37, %v2839_v37  ;;  %5270 = vmatprep.subr.bf16.mxu0 %v5666_v59  ;;  %v5640_v37 = vld [vmem:[%s6924_s7 + $0x2c0] sm:$0xff]  }
 0x4e4   : > { %v5229_v16 = vpop.f32.mrf.mxu1 }
 0x4e5   : > { %v1635_v17 = vpop.f32.mrf.mxu0  ;;  %5247 = vmatmul.mubr.bf16.vlgmr.msra.gmra.mxu0 %v2840_v14  ;;  %v5641_v16 = vld [vmem:[%s6924_s7 + $0x338] sm:$0xff]  }
 0x4e6   : > { %v1636_v19 = vadd.f32 %v4050_v15, %v1635_v17  ;;  %5271 = vmatpush3.bf16.msra.mxu0 %v5617_v61  ;;  %5286 = vmatprep.mubr.msk.bf16.mxu0 %vm5668_vm10, %v5666_v59 }
 0x4e7   : > { %v5008_v22 = vpop.f32.mrf.mxu0  ;;  %5272 = vmatprep.subr.bf16.mxu0 %v5666_v59 }
 0x4e8   : > { %3825 = vst [vmem:[%s6364_s27 + $0x2] sm:$0x1] %v1636_v19  ;;  %v4200_v19 = vld [vmem:[%s6925_s8 + $0x5] sm:$0x1] }
 0x4e9   : > { %v1638_v23 = vpop.f32.mrf.mxu0 }
 0x4ea   : > { %5273 = vmatpush3.bf16.msra.mxu0 %v5618_v21 }
 0x4eb   : > { %v5009_v25 = vpop.f32.mrf.mxu0  ;;  %5274 = vmatprep.subr.bf16.mxu0 %v5666_v59 }
 0x4ee   : > { %5275 = vmatpush3.bf16.msra.mxu0 %v5619_v24  ;;  %v5642_v24 = vld [vmem:[%s6924_s7 + $0x330] sm:$0xff]  }
 0x4ef   : > { %5276 = vmatprep.subr.bf16.mxu0 %v5666_v59 }
 0x4f2   : > { %5277 = vmatpush3.bf16.msra.mxu0 %v5620_v26 }
 0x4f3   : > { %5278 = vmatprep.subr.bf16.mxu0 %v5666_v59 }
 0x4f6   : > { %5279 = vmatpush3.bf16.msra.mxu0 %v5621_v27  ;;  %v5643_v27 = vld [vmem:[%s6924_s7 + $0x328] sm:$0xff]  }
 0x4f7   : > { %5280 = vmatprep.subr.bf16.mxu0 %v5666_v59 }
 0x4fa   : > { %5281 = vmatpush3.bf16.msra.mxu0 %v5622_v29 }
 0x4fb   : > { %5282 = vmatprep.subr.bf16.mxu0 %v5666_v59 }
 0x4fe   : > { %v3053_v32 = vpop.f32.mrf.mxu1  ;;  %5283 = vmatpush3.bf16.msra.mxu0 %v5623_v31  ;;  %v5644_v31 = vld [vmem:[%s6924_s7 + $0x320] sm:$0xff]  }
 0x4ff   : > { %v3054_v35 = vadd.f32 %v4375_v13, %v3053_v32  ;;  %5284 = vmatprep.subr.bf16.mxu0 %v5666_v59  ;;  %v5645_v13 = vld [vmem:[%s6924_s7 + $0x318] sm:$0xff]   ;;  %v5646_v32 = vld [vmem:[%s6924_s7 + $0x310] sm:$0xff]  }
 0x500   : > { %v5268_v36 = vpop.f32.mrf.mxu1 }
 0x501   : > { %v3059_v57 = vmax.f32 %v3054_v35, 0.0  ;;  %v4525_v35 = vld [vmem:[%s6923_s6 + $0xc] sm:$0x1] }
 0x502   : > { %v3056_v38 = vpop.f32.mrf.mxu1  ;;  %5285 = vmatpush3.bf16.msra.mxu0 %v5624_v33  ;;  %v5647_v33 = vld [vmem:[%s6924_s7 + $0x308] sm:$0xff]  }
 0x503   : > { %v3060_v39 = vpack.c.bf16 %v3059_v57, %v3059_v57  ;;  %5310 = vmatprep.subr.bf16.mxu0 %v5666_v59  ;;  %v5648_v57 = vld [vmem:[%s6924_s7 + $0x300] sm:$0xff]  }
 0x504   : > { %v5269_v30 = vpop.f32.mrf.mxu1 }
 0x505   : > { %v1853_v41 = vpop.f32.mrf.mxu0  ;;  %5287 = vmatmul.mubr.bf16.vlgmr.msra.gmra.mxu0 %v3060_v39 }
 0x506   : > { %v1854_v42 = vadd.f32 %v4100_v40, %v1853_v41  ;;  %5311 = vmatpush3.bf16.msra.mxu0 %v5625_v28  ;;  %5326 = vmatprep.mubr.msk.bf16.mxu0 %vm5668_vm10, %v5666_v59  ;;  %v4250_v41 = vld [vmem:[%s6925_s8 + $0x6] sm:$0x1] }
 0x507   : > { %v5048_v44 = vpop.f32.mrf.mxu0  ;;  %5312 = vmatprep.subr.bf16.mxu0 %v5666_v59 }
 0x508   : > { %3826 = vst [vmem:[%s6364_s27 + $0x3] sm:$0x1] %v1854_v42 }
 0x509   : > { %v1856_v45 = vpop.f32.mrf.mxu0 }
 0x50a   : > { %5313 = vmatpush3.bf16.msra.mxu0 %v5626_v43 }
 0x50b   : > { %v5049_v49 = vpop.f32.mrf.mxu0  ;;  %5314 = vmatprep.subr.bf16.mxu0 %v5666_v59 }
 0x50e   : > { %5315 = vmatpush3.bf16.msra.mxu0 %v5627_v47 }
 0x50f   : > { %5316 = vmatprep.subr.bf16.mxu0 %v5666_v59 }
 0x512   : > { %5317 = vmatpush3.bf16.msra.mxu0 %v5628_v46 }
 0x513   : > { %5318 = vmatprep.subr.bf16.mxu0 %v5666_v59 }
 0x516   : > { %5319 = vmatpush3.bf16.msra.mxu0 %v5629_v52 }
 0x517   : > { %5320 = vmatprep.subr.bf16.mxu0 %v5666_v59 }
 0x51a   : > { %5321 = vmatpush3.bf16.msra.mxu0 %v5630_v54 }
 0x51b   : > { %5322 = vmatprep.subr.bf16.mxu0 %v5666_v59 }
 0x51e   : > { %v3272_v2 = vpop.f32.mrf.mxu1  ;;  %5323 = vmatpush3.bf16.msra.mxu0 %v5631_v55 }
 0x51f   : > { %v3273_v3 = vadd.f32 %v4425_v56, %v3272_v2  ;;  %5324 = vmatprep.subr.bf16.mxu0 %v5666_v59  ;;  %v4350_v2 = vld [vmem:[%s6925_s8 + $0x8] sm:$0x1] }
 0x520   : > { %v5308_v0 = vpop.f32.mrf.mxu1 }
 0x521   : > { %v3278_v4 = vmax.f32 %v3273_v3, 0.0 }
 0x522   : > { %v3275_v50 = vpop.f32.mrf.mxu1  ;;  %5325 = vmatpush3.bf16.msra.mxu0 %v5632_v53 }
 0x523   : > { %v3279_v5 = vpack.c.bf16 %v3278_v4, %v3278_v4  ;;  %5350 = vmatprep.subr.bf16.mxu0 %v5666_v59 }
 0x524   : > { %v5309_v1 = vpop.f32.mrf.mxu1 }
 0x525   : > { %v2071_v8 = vpop.f32.mrf.mxu0  ;;  %5327 = vmatmul.mubr.bf16.vlgmr.msra.gmra.mxu0 %v3279_v5 }
 0x526   : > { %v2072_v9 = vadd.f32 %v4150_v6, %v2071_v8  ;;  %5351 = vmatpush3.bf16.msra.mxu0 %v5633_v62  ;;  %5366 = vmatprep.mubr.msk.bf16.mxu0 %vm5668_vm10, %v5666_v59  ;;  %v4400_v62 = vld [vmem:[%s6925_s8 + $0x9] sm:$0x1] }
 0x527   : > { %v5088_v63 = vpop.f32.mrf.mxu0  ;;  %5352 = vmatprep.subr.bf16.mxu0 %v5666_v59 }
 0x528   : > { %3827 = vst [vmem:[%s6364_s27 + $0x4] sm:$0x1] %v2072_v9 }
 0x529   : > { %v2074_v60 = vpop.f32.mrf.mxu0 }
 0x52a   : > { %5353 = vmatpush3.bf16.msra.mxu0 %v5634_v10  ;;  %v4450_v10 = vld [vmem:[%s6925_s8 + $0xa] sm:$0x1] }
 0x52b   : > { %v5089_v11 = vpop.f32.mrf.mxu0  ;;  %5354 = vmatprep.subr.bf16.mxu0 %v5666_v59 }
 0x52e   : > { %5355 = vmatpush3.bf16.msra.mxu0 %v5635_v7 }
 0x52f   : > { %5356 = vmatprep.subr.bf16.mxu0 %v5666_v59 }
 0x532   : > { %5357 = vmatpush3.bf16.msra.mxu0 %v5636_v12 }
 0x533   : > { %5358 = vmatprep.subr.bf16.mxu0 %v5666_v59 }
 0x536   : > { %5359 = vmatpush3.bf16.msra.mxu0 %v5637_v58  ;;  %v4500_v58 = vld [vmem:[%s6925_s8 + $0xb] sm:$0x1] }
 0x537   : > { %5360 = vmatprep.subr.bf16.mxu0 %v5666_v59 }
 0x53a   : > { %5361 = vmatpush3.bf16.msra.mxu0 %v5638_v20 }
 0x53b   : > { %5362 = vmatprep.subr.bf16.mxu0 %v5666_v59 }
 0x53e   : > { %v3490_v34 = vpop.f32.mrf.mxu1  ;;  %5363 = vmatpush3.bf16.msra.mxu0 %v5639_v48 }
 0x53f   : > { %v3491_v51 = vadd.f32 %v4475_v18, %v3490_v34  ;;  %5364 = vmatprep.subr.bf16.mxu0 %v5666_v59 }
 0x540   : > { %v5348_v61 = vpop.f32.mrf.mxu1 }
 0x541   : > { %v3496_v14 = vmax.f32 %v3491_v51, 0.0  ;;  %v4550_v51 = vld [vmem:[%s6925_s8 + $0xc] sm:$0x1] }
 0x542   : > { %v3493_v15 = vpop.f32.mrf.mxu1  ;;  %5365 = vmatpush3.bf16.msra.mxu0 %v5640_v37 }
 0x543   : > { %v3497_v17 = vpack.c.bf16 %v3496_v14, %v3496_v14  ;;  %5390 = vmatprep.subr.bf16.mxu0 %v5666_v59 }
 0x544   : > { %v5349_v21 = vpop.f32.mrf.mxu1 }
 0x545   : > { %v2289_v22 = vpop.f32.mrf.mxu0  ;;  %5367 = vmatmul.mubr.bf16.vlgmr.msra.gmra.mxu0 %v3497_v17 }
 0x546   : > { %v2290_v23 = vadd.f32 %v4200_v19, %v2289_v22  ;;  %5391 = vmatpush3.bf16.msra.mxu0 %v5641_v16  ;;  %5406 = vmatprep.mubr.msk.bf16.mxu0 %vm5668_vm10, %v5666_v59 }
 0x547   : > { %v5128_v25 = vpop.f32.mrf.mxu0  ;;  %5392 = vmatprep.subr.bf16.mxu0 %v5666_v59 }
 0x548   : > { %3828 = vst [vmem:[%s6364_s27 + $0x5] sm:$0x1] %v2290_v23 }
 0x549   : > { %v2292_v26 = vpop.f32.mrf.mxu0 }
 0x54a   : > { %5393 = vmatpush3.bf16.msra.mxu0 %v5642_v24 }
 0x54b   : > { %v5129_v29 = vpop.f32.mrf.mxu0  ;;  %5394 = vmatprep.subr.bf16.mxu0 %v5666_v59 }
 0x54e   : > { %5395 = vmatpush3.bf16.msra.mxu0 %v5643_v27 }
 0x54f   : > { %5396 = vmatprep.subr.bf16.mxu0 %v5666_v59 }
 0x552   : > { %5397 = vmatpush3.bf16.msra.mxu0 %v5644_v31 }
 0x553   : > { %5398 = vmatprep.subr.bf16.mxu0 %v5666_v59 }
 0x556   : > { %5399 = vmatpush3.bf16.msra.mxu0 %v5645_v13 }
 0x557   : > { %5400 = vmatprep.subr.bf16.mxu0 %v5666_v59 }
 0x55a   : > { %5401 = vmatpush3.bf16.msra.mxu0 %v5646_v32 }
 0x55b   : > { %5402 = vmatprep.subr.bf16.mxu0 %v5666_v59 }
 0x55e   : > { %v3708_v36 = vpop.f32.mrf.mxu1  ;;  %5403 = vmatpush3.bf16.msra.mxu0 %v5647_v33 }
 0x55f   : > { %v3709_v38 = vadd.f32 %v4525_v35, %v3708_v36  ;;  %5404 = vmatprep.subr.bf16.mxu0 %v5666_v59  ;;  %v4300_v59 = vld [vmem:[%s6925_s8 + $0x7] sm:$0x1] }
 0x560   : > { %v5388_v28 = vpop.f32.mrf.mxu1 }
 0x561   : > { %v3714_v39 = vmax.f32 %v3709_v38, 0.0 }
 0x562   : > { %v3711_v40 = vpop.f32.mrf.mxu1  ;;  %5405 = vmatpush3.bf16.msra.mxu0 %v5648_v57 }
 0x563   : > { %v3715_v30 = vpack.c.bf16 %v3714_v39, %v3714_v39 }
 0x564   : > { %v5389_v42 = vpop.f32.mrf.mxu1 }
 0x565   : > { %v2507_v43 = vpop.f32.mrf.mxu0  ;;  %5407 = vmatmul.mubr.bf16.vlgmr.msra.gmra.mxu0 %v3715_v30 }
 0x566   : > { %v2508_v44 = vadd.f32 %v4250_v41, %v2507_v43 }
 0x567   : > { %v5168_v45 = vpop.f32.mrf.mxu0 }
 0x568   : > { %3829 = vst [vmem:[%s6364_s27 + $0x6] sm:$0x1] %v2508_v44 }
 0x569   : > { %v2510_v47 = vpop.f32.mrf.mxu0 }
 0x56b   : > { %v5169_v49 = vpop.f32.mrf.mxu0 }
 0x585   : > { %v2725_v46 = vpop.f32.mrf.mxu0 }
 0x586   : > { %v2726_v52 = vadd.f32 %v4300_v59, %v2725_v46 }
 0x587   : > { %v5208_v54 = vpop.f32.mrf.mxu0 }
 0x588   : > { %3830 = vst [vmem:[%s6364_s27 + $0x7] sm:$0x1] %v2726_v52 }
 0x589   : > { %v2728_v55 = vpop.f32.mrf.mxu0 }
 0x58b   : > { %v5209_v56 = vpop.f32.mrf.mxu0 }
 0x5a5   : > { %v2942_v53 = vpop.f32.mrf.mxu0 }
 0x5a6   : > { %v2943_v3 = vadd.f32 %v4350_v2, %v2942_v53 }
 0x5a7   : > { %v5248_v0 = vpop.f32.mrf.mxu0 }
 0x5a8   : > { %3831 = vst [vmem:[%s6364_s27 + $0x8] sm:$0x1] %v2943_v3 }
 0x5a9   : > { %v2945_v4 = vpop.f32.mrf.mxu0 }
 0x5ab   : > { %v5249_v50 = vpop.f32.mrf.mxu0 }
 0x5c5   : > { %v3162_v5 = vpop.f32.mrf.mxu0 }
 0x5c6   : > { %v3163_v6 = vadd.f32 %v4400_v62, %v3162_v5 }
 0x5c7   : > { %v5288_v1 = vpop.f32.mrf.mxu0 }
 0x5c8   : > { %3832 = vst [vmem:[%s6364_s27 + $0x9] sm:$0x1] %v3163_v6 }
 0x5c9   : > { %v3165_v8 = vpop.f32.mrf.mxu0 }
 0x5cb   : > { %v5289_v9 = vpop.f32.mrf.mxu0 }
 0x5e5   : > { %v3381_v63 = vpop.f32.mrf.mxu0 }
 0x5e6   : > { %v3382_v60 = vadd.f32 %v4450_v10, %v3381_v63 }
 0x5e7   : > { %v5328_v7 = vpop.f32.mrf.mxu0 }
 0x5e8   : > { %3833 = vst [vmem:[%s6364_s27 + $0xa] sm:$0x1] %v3382_v60 }
 0x5e9   : > { %v3384_v11 = vpop.f32.mrf.mxu0 }
 0x5eb   : > { %v5329_v12 = vpop.f32.mrf.mxu0 }
 0x605   : > { %v3599_v20 = vpop.f32.mrf.mxu0 }
 0x606   : > { %v3600_v48 = vadd.f32 %v4500_v58, %v3599_v20 }
 0x607   : > { %v5368_v18 = vpop.f32.mrf.mxu0 }
 0x608   : > { %3834 = vst [vmem:[%s6364_s27 + $0xb] sm:$0x1] %v3600_v48 }
 0x609   : > { %v3602_v34 = vpop.f32.mrf.mxu0 }
 0x60b   : > { %v5369_v37 = vpop.f32.mrf.mxu0 }
 0x625   : > { %v3817_v61 = vpop.f32.mrf.mxu0 }
 0x626   : > { %v3818_v14 = vadd.f32 %v4550_v51, %v3817_v61 }
 0x627   : > { %v5408_v15 = vpop.f32.mrf.mxu0 }
 0x628   : > { %3835 = vst [vmem:[%s6364_s27 + $0xc] sm:$0x1] %v3818_v14 }
 0x629   : > { %v3820_v16 = vpop.f32.mrf.mxu0 }
 0x62b   : > { %v5409_v17 = vpop.f32.mrf.mxu0 }
 0x62c PF: > { %s19_s30 = sadd.s32 1, %s5663_s30  }
 0x62d   : > { %p16_p4 = scmp.ge.s32.totalorder %s19_s30, 4  }
 0x62f   :  { %18 = sbr.rel (!%p16_p4) target bundleno = 1 (0x1), region = 134 }

</bundles_post_ra>
